<compile_context>
chip_gen: v6e
topology: v6e:2x2x1
jax: 0.10.0
libtpu: 0.0.40
codegen_flags: <defaults>
</compile_context>

<pallas_src>
from functools import partial

import numpy as np
import jax
import jax.numpy as jnp
from jax.experimental import pallas as pl
from jax.experimental.pallas import tpu as pltpu

# ----------------------------------------------------------------------------
# Static lookup tables (from the PyTorch module)
# ----------------------------------------------------------------------------
_TEMP_TABLE = np.arange(-62.0, 97.0, 2.0, dtype=np.float64)  # 80 temperatures
_PRESS_TABLE = np.array([
    13.9, 15.9, 18.1, 20.5, 23.2, 26.2, 29.5, 33.1, 37.0, 41.3,
    46.1, 51.2, 56.8, 62.9, 69.5, 76.7, 84.4, 92.7, 101.7, 111.3,
    121.6, 132.7, 144.6, 157.3, 170.8, 185.2, 200.6, 216.9, 234.3, 252.7,
    272.2, 292.8, 314.6, 337.7, 362.0, 387.6, 414.6, 443.0, 472.9, 504.3,
    537.2, 571.7, 607.9, 645.8, 685.4, 726.9, 770.2, 815.4, 862.6, 911.8,
    963.2, 1016.6, 1072.2, 1130.1, 1190.3, 1252.9, 1317.9, 1385.4, 1455.5,
    1528.2, 1603.6, 1681.8, 1762.8, 1846.7, 1933.7, 2023.7, 2116.8, 2213.2,
    2313.0, 2416.1, 2522.8, 2633.2, 2747.3, 2865.3, 2987.4, 3113.6, 3244.2,
    3379.3, 3519.3, 3664.5], dtype=np.float64)                # 80 pressures

_CP_PID_KP = np.array([1.5, 0.8984375, 0.55078125, 0.0, 0.0,
                       0.44921875, 0.6015625, 0.8984375], dtype=np.float64)
_CP_PID_KI = np.array([0.0500488, 0.0200195, 0.0080566, 0.0024414,
                       0.0024414, 0.0080566, 0.0200195, 0.0500488],
                      dtype=np.float64)
_CP_DIFFP = np.array([-10, -5, -2, -0.75, 0.75, 2, 5, 10], dtype=np.float64)


def _pwl_coeffs(xs, ys):
    """Hinge-form piecewise-linear coeffs: y = a + b*q + sum d_j*relu(q-k_j)."""
    xs = np.asarray(xs, np.float64)
    ys = np.asarray(ys, np.float64)
    slopes = (ys[1:] - ys[:-1]) / (xs[1:] - xs[:-1])
    a = float(ys[0] - slopes[0] * xs[0])
    b = float(slopes[0])
    knots = xs[1:-1].astype(np.float32)               # internal knots
    deltas = (slopes[1:] - slopes[:-1]).astype(np.float32)
    return a, b, knots, deltas


# Static PWL offsets/slopes baked as Python literals (become immediates).
SAT_A, SAT_B, SAT_KNOTS, SAT_DELTAS = _pwl_coeffs(_PRESS_TABLE, _TEMP_TABLE)
KP_A, KP_B, PID_KNOTS, KP_DELTAS = _pwl_coeffs(_CP_DIFFP, _CP_PID_KP)
KI_A, KI_B, _PID_KNOTS_KI, KI_DELTAS = _pwl_coeffs(_CP_DIFFP, _CP_PID_KI)
assert np.array_equal(PID_KNOTS, _PID_KNOTS_KI)       # Kp/Ki share breakpoints

# Clamp-aware hinge lengths (multiples of 8 sublanes):
#   hi_pressure <= 2400  -> knots >= 2416.1 never fire -> 68 knots -> 72 rows
#   lo_pressure <= 1100  -> knots >= 1130.1 never fire -> 52 knots -> 56 rows
N_SAT_HI = 72
N_SAT_LO = 56

# Per-feature clamp bounds (x rows: sc_tar, sh_tar, t_ph_1, t_ph_5,
#                                    hi_p, lo_p, comp_speed(unused), last_pid).
# Row 6 (compressor_speed) is not used by the forward math, so it is pinned to
# the constant 1.0 and carries the layer-1 bias inside the K=8 matmul.
_CLAMP_LO = np.array([-100., -100., -100., -100., 0., 0., 1.0, 0.], np.float32)
_CLAMP_HI = np.array([100., 100., 100., 100., 2400., 1100., 1.0, 100.], np.float32)


# ----------------------------------------------------------------------------
# Pallas kernel: whole forward pass for one batch block (batch along lanes)
# ----------------------------------------------------------------------------
def _my_model_kernel(scal_ref, x_ref, colt_ref, w1_ref, w2_ref, b2_ref,
                     w3_ref, out_ref):
    x = x_ref[...]                        # (8, bn) f32, features in sublanes
    colt = colt_ref[...]                  # (80, 8) packed tables

    lo_b = colt[0:8, 5:6]                 # (8,1) per-feature clamp lo
    hi_b = colt[0:8, 6:7]                 # (8,1) per-feature clamp hi
    xc = jnp.minimum(jnp.maximum(x, lo_b), hi_b)      # vectorized column clamps

    sc_tar = xc[0:1, :]
    sh_tar = xc[1:2, :]
    t_ph1 = xc[2:3, :]
    t_ph5 = xc[3:4, :]
    hi_p = xc[4:5, :]
    lo_p = xc[5:6, :]
    last_pid = xc[7:8, :]

    # Saturation-pressure -> temperature lookup: VPU multiply by the delta
    # column + sublane (XLU) reduce; clamp-aware hinge length (no MXU push).
    def tem_sat_press(q, rows):           # q: (1, bn) -> temperature (1, bn)
        k = colt[0:rows, 0:1]             # knots
        d = colt[0:rows, 1:2]             # slope deltas
        hinge = jnp.maximum(q - k, 0.0)                           # (rows, bn)
        s = jnp.sum(hinge * d, axis=0, keepdims=True)
        return SAT_A + SAT_B * q + s

    t_sat_lo = tem_sat_press(lo_p, N_SAT_LO)
    t_sat_hi = tem_sat_press(hi_p, N_SAT_HI)

    sh_rel = t_ph1 - t_sat_lo
    sc_rel = t_sat_hi - t_ph5
    sc_raw = sc_rel - sc_tar
    sc_off = sh_rel - sh_tar
    sc_err = sc_raw + sc_off

    # Kp / Ki share breakpoints -> one hinge matrix, two weighted sublane sums.
    pid_k = colt[0:8, 2:3]
    kp_d = colt[0:8, 3:4]
    ki_d = colt[0:8, 4:5]
    hinge_pid = jnp.maximum(sc_err - pid_k, 0.0)                  # (8, bn)
    kp = KP_A + KP_B * sc_err + jnp.sum(hinge_pid * kp_d, axis=0, keepdims=True)
    ki = KI_A + KI_B * sc_err + jnp.sum(hinge_pid * ki_d, axis=0, keepdims=True)

    # Gating kept exactly as written in the PyTorch source (incl. SCRaw != 0).
    ki_zero = ((sc_err < 0.0) | (sc_raw < 0.0)
               | (last_pid >= 38.0) | (sc_raw != 0.0))
    ki = jnp.where(ki_zero, 0.0, ki)

    delta = 30.0 + ki * sc_err
    offset = kp * sc_err + delta                                   # (1, bn)

    # MLP1 (4 -> 256 -> 256 -> 1), hidden along sublanes, batch along lanes.
    # Layer-1 bias rides in w1 column 6 against the constant-1.0 feature row.
    pre1 = jnp.dot(w1_ref[...], xc, preferred_element_type=jnp.float32)
    h1 = jnp.tanh(pre1.astype(jnp.bfloat16))                       # (256, bn) bf16
    h2 = jnp.tanh(jnp.dot(w2_ref[...], h1,
                          preferred_element_type=jnp.float32)
                  + b2_ref[...])                                   # (256, bn) f32

    # Layer 3: (1,256) row as VPU multiply + sublane reduce (f32 accumulation),
    # keeping the MXU free of another M=1 stream.
    b3 = scal_ref[1]
    part1 = jnp.sum(h2 * w3_ref[...], axis=0, keepdims=True) + b3  # (1, bn)

    k1 = scal_ref[0]
    exv = last_pid + (offset + part1) * k1
    out_ref[...] = jnp.clip(exv, 12.0, 100.0)


# ----------------------------------------------------------------------------
# Parameter setup (deterministic synthetic init: xavier weights, zero biases)
# ----------------------------------------------------------------------------
def make_params(key):
    k1_key, kw1, kw2, kw3 = jax.random.split(key, 4)

    def xavier(k, fan_out, fan_in):
        bound = np.sqrt(6.0 / (fan_in + fan_out))
        return jax.random.uniform(k, (fan_out, fan_in), jnp.float32,
                                  -bound, bound)

    w1 = xavier(kw1, 256, 4)      # torch Linear(4, 256).weight   (out, in)
    w2 = xavier(kw2, 256, 256)    # torch Linear(256, 256).weight
    w3 = xavier(kw3, 1, 256)      # torch Linear(256, 1).weight
    k1 = jax.random.normal(k1_key, (), jnp.float32)
    b1 = jnp.zeros((256,), jnp.float32)   # torch init zeros biases
    b2 = jnp.zeros((256, 1), jnp.float32)
    b3 = jnp.zeros((), jnp.float32)

    # Layer-1 weight permuted/padded so column j multiplies x feature row j.
    # MLP1 inputs are [t_ph_5, hi_p, t_ph_1, lo_p] = x rows [3, 4, 2, 5];
    # column 6 holds b1 (feature row 6 is clamped to the constant 1.0).
    w1p = jnp.zeros((256, 8), jnp.float32)
    for j, r in enumerate((3, 4, 2, 5)):
        w1p = w1p.at[:, r].set(w1[:, j])
    w1p = w1p.at[:, 6].set(b1)

    colt = np.zeros((80, 8), np.float32)
    colt[:SAT_KNOTS.size, 0] = SAT_KNOTS
    colt[:SAT_DELTAS.size, 1] = SAT_DELTAS
    colt[:PID_KNOTS.size, 2] = PID_KNOTS
    colt[:KP_DELTAS.size, 3] = KP_DELTAS
    colt[:KI_DELTAS.size, 4] = KI_DELTAS
    colt[:8, 5] = _CLAMP_LO
    colt[:8, 6] = _CLAMP_HI

    scal = jnp.stack([k1, b3])            # (2,) -> SMEM scalars [k1, b3]

    return dict(scal=scal,
                colt=jnp.asarray(colt),
                w1p=w1p,
                w2m=w2.astype(jnp.bfloat16),          # bf16 MXU operand
                b2=b2,
                w3col=w3.T)                           # (256, 1) f32


# ----------------------------------------------------------------------------
# Wrapper: transpose/pad fused inside the same jit, then the gridded kernel
# ----------------------------------------------------------------------------
@partial(jax.jit, static_argnames=("block_n",))
def my_model_forward(x1, params, block_n=4096):
    x = jnp.reshape(x1, (-1, 8)).astype(jnp.float32)
    n = x.shape[0]

    lane_n = ((n + 127) // 128) * 128
    bn = min(int(block_n), lane_n)
    if lane_n >= 256:
        # Guarantee >= 2 grid steps so "parallel" can shard across v7x's 2 TCs.
        half = ((lane_n // 2 + 127) // 128) * 128
        bn = min(bn, half)
    bn = max(128, (bn // 128) * 128)
    n_pad = ((n + bn - 1) // bn) * bn

    xt = jnp.pad(x.T, ((0, 0), (0, n_pad - n)))       # (8, n_pad), fused in jit

    out = pl.pallas_call(
        _my_model_kernel,
        out_shape=jax.ShapeDtypeStruct((1, n_pad), jnp.float32),
        grid=(n_pad // bn,),
        in_specs=[
            pl.BlockSpec(memory_space=pltpu.MemorySpace.SMEM),  # [k1, b3]
            pl.BlockSpec((8, bn), lambda i: (0, i)),       # x (batch in lanes)
            pl.BlockSpec((80, 8), lambda i: (0, 0)),       # packed tables
            pl.BlockSpec((256, 8), lambda i: (0, 0)),      # W1 (permuted, b1 folded)
            pl.BlockSpec((256, 256), lambda i: (0, 0)),    # W2 (bf16)
            pl.BlockSpec((256, 1), lambda i: (0, 0)),      # b2
            pl.BlockSpec((256, 1), lambda i: (0, 0)),      # W3 column (f32)
        ],
        out_specs=pl.BlockSpec((1, bn), lambda i: (0, i)),
        compiler_params=pltpu.CompilerParams(
            dimension_semantics=("parallel",),
            vmem_limit_bytes=48 * 1024 * 1024),
    )(params["scal"], xt, params["colt"], params["w1p"],
      params["w2m"], params["b2"], params["w3col"])

    return out[0, :n].reshape(n, 1)


# ----------------------------------------------------------------------------
if __name__ == "__main__":
    key = jax.random.PRNGKey(0)
    pkey, xkey = jax.random.split(key)
    params = make_params(pkey)

    # Small batch of 16 samples, 8 features each (forward views input as (-1, 8)).
    N = 16
    cols = jax.random.uniform(xkey, (N, 8), jnp.float32)
    x = jnp.stack([
        cols[:, 0] * 20.0 - 10.0,      # sc_tar_mode_10
        cols[:, 1] * 20.0 - 10.0,      # sh_tar_mode_10
        cols[:, 2] * 60.0 - 20.0,      # temp_p_h_1_cab_heating
        cols[:, 3] * 60.0 - 10.0,      # temp_p_h_5
        cols[:, 4] * 1500.0 + 900.0,   # hi_pressure
        cols[:, 5] * 600.0 + 100.0,    # lo_pressure
        cols[:, 6] * 8000.0,           # compressor_speed_last (unused)
        cols[:, 7] * 100.0,            # last_exv_oh_pid
    ], axis=1)

    out = jax.block_until_ready(my_model_forward(x, params))
    assert out.shape == (N, 1), out.shape
    assert bool(jnp.all(jnp.isfinite(out)))
    assert bool(jnp.all((out >= 12.0) & (out <= 100.0)))

    # Larger batch exercising the multi-step "parallel" grid (2 blocks of 1024).
    N2 = 2048
    x2 = jnp.tile(x, (N2 // N, 1))
    out2 = jax.block_until_ready(my_model_forward(x2, params))
    assert out2.shape == (N2, 1), out2.shape
    assert bool(jnp.all(jnp.isfinite(out2)))
    assert bool(jnp.allclose(out2[:N], out, atol=1e-5, rtol=1e-5))

    print("KERNEL_OK")
</pallas_src>

<mosaic_0001>
module attributes {stable_mosaic.version = 11 : i64} {
  func.func @_my_model_kernel(%arg0: i32, %arg1: memref<2xf32, #tpu.memory_space<smem>>, %arg2: memref<8x128xf32, #tpu.memory_space<vmem>>, %arg3: memref<80x8xf32, #tpu.memory_space<vmem>>, %arg4: memref<256x8xf32, #tpu.memory_space<vmem>>, %arg5: memref<256x256xbf16, #tpu.memory_space<vmem>>, %arg6: memref<256x1xf32, #tpu.memory_space<vmem>>, %arg7: memref<256x1xf32, #tpu.memory_space<vmem>>, %arg8: memref<1x128xf32, #tpu.memory_space<vmem>>) attributes {dimension_semantics = [#tpu.dimension_semantics<parallel>], iteration_bounds = array<i64: 1>, scalar_prefetch = 0 : i64, scratch_operands = 0 : i64, tpu.core_type = #tpu.core_type<tc>, window_params = [{transform_indices = @transform_0, window_bounds = array<i64: 2>}, {transform_indices = @transform_1, window_bounds = array<i64: 8, 128>}, {pipeline_mode = #tpu.pipeline_mode<synchronous>, transform_indices = @transform_2, window_bounds = array<i64: 80, 8>}, {pipeline_mode = #tpu.pipeline_mode<synchronous>, transform_indices = @transform_3, window_bounds = array<i64: 256, 8>}, {pipeline_mode = #tpu.pipeline_mode<synchronous>, transform_indices = @transform_4, window_bounds = array<i64: 256, 256>}, {pipeline_mode = #tpu.pipeline_mode<synchronous>, transform_indices = @transform_5, window_bounds = array<i64: 256, 1>}, {pipeline_mode = #tpu.pipeline_mode<synchronous>, transform_indices = @transform_6, window_bounds = array<i64: 256, 1>}, {transform_indices = @transform_7, window_bounds = array<i64: 1, 128>}]} {
    %c0 = arith.constant 0 : index
    %c0_0 = arith.constant 0 : index
    %0 = vector.load %arg2[%c0, %c0_0] : memref<8x128xf32, #tpu.memory_space<vmem>>, vector<8x128xf32>
    %c0_1 = arith.constant 0 : index
    %c0_2 = arith.constant 0 : index
    %1 = vector.load %arg3[%c0_1, %c0_2] : memref<80x8xf32, #tpu.memory_space<vmem>>, vector<80x8xf32>
    %2 = vector.extract_strided_slice %1 {offsets = [0, 5], sizes = [8, 1], strides = [1, 1]} : vector<80x8xf32> to vector<8x1xf32>
    %3 = vector.extract_strided_slice %1 {offsets = [0, 6], sizes = [8, 1], strides = [1, 1]} : vector<80x8xf32> to vector<8x1xf32>
    %4 = vector.broadcast %2 : vector<8x1xf32> to vector<8x128xf32>
    %5 = arith.maximumf %0, %4 : vector<8x128xf32>
    %6 = vector.broadcast %3 : vector<8x1xf32> to vector<8x128xf32>
    %7 = arith.minimumf %5, %6 : vector<8x128xf32>
    %8 = vector.extract_strided_slice %7 {offsets = [0, 0], sizes = [1, 128], strides = [1, 1]} : vector<8x128xf32> to vector<1x128xf32>
    %9 = vector.extract_strided_slice %7 {offsets = [1, 0], sizes = [1, 128], strides = [1, 1]} : vector<8x128xf32> to vector<1x128xf32>
    %10 = vector.extract_strided_slice %7 {offsets = [2, 0], sizes = [1, 128], strides = [1, 1]} : vector<8x128xf32> to vector<1x128xf32>
    %11 = vector.extract_strided_slice %7 {offsets = [3, 0], sizes = [1, 128], strides = [1, 1]} : vector<8x128xf32> to vector<1x128xf32>
    %12 = vector.extract_strided_slice %7 {offsets = [4, 0], sizes = [1, 128], strides = [1, 1]} : vector<8x128xf32> to vector<1x128xf32>
    %13 = vector.extract_strided_slice %7 {offsets = [5, 0], sizes = [1, 128], strides = [1, 1]} : vector<8x128xf32> to vector<1x128xf32>
    %14 = vector.extract_strided_slice %7 {offsets = [7, 0], sizes = [1, 128], strides = [1, 1]} : vector<8x128xf32> to vector<1x128xf32>
    %15 = vector.extract_strided_slice %1 {offsets = [0, 0], sizes = [56, 1], strides = [1, 1]} : vector<80x8xf32> to vector<56x1xf32>
    %16 = vector.extract_strided_slice %1 {offsets = [0, 1], sizes = [56, 1], strides = [1, 1]} : vector<80x8xf32> to vector<56x1xf32>
    %17 = vector.broadcast %13 : vector<1x128xf32> to vector<56x128xf32>
    %18 = vector.broadcast %15 : vector<56x1xf32> to vector<56x128xf32>
    %19 = arith.subf %17, %18 : vector<56x128xf32>
    %cst = arith.constant 0.000000e+00 : f32
    %20 = vector.broadcast %cst : f32 to vector<56x128xf32>
    %21 = arith.maximumf %19, %20 : vector<56x128xf32>
    %22 = vector.broadcast %16 : vector<56x1xf32> to vector<56x128xf32>
    %23 = arith.mulf %21, %22 : vector<56x128xf32>
    %cst_3 = arith.constant dense<0.000000e+00> : vector<128xf32>
    %24 = vector.multi_reduction <add>, %23, %cst_3 [0] : vector<56x128xf32> to vector<128xf32>
    %25 = vector.shape_cast %24 : vector<128xf32> to vector<1x128xf32>
    %cst_4 = arith.constant 1.000000e+00 : f32
    %26 = vector.broadcast %cst_4 : f32 to vector<1x128xf32>
    %27 = arith.mulf %26, %13 : vector<1x128xf32>
    %cst_5 = arith.constant -7.590000e+01 : f32
    %28 = vector.broadcast %cst_5 : f32 to vector<1x128xf32>
    %29 = arith.addf %28, %27 : vector<1x128xf32>
    %30 = arith.addf %29, %25 : vector<1x128xf32>
    %31 = vector.extract_strided_slice %1 {offsets = [0, 0], sizes = [72, 1], strides = [1, 1]} : vector<80x8xf32> to vector<72x1xf32>
    %32 = vector.extract_strided_slice %1 {offsets = [0, 1], sizes = [72, 1], strides = [1, 1]} : vector<80x8xf32> to vector<72x1xf32>
    %33 = vector.broadcast %12 : vector<1x128xf32> to vector<72x128xf32>
    %34 = vector.broadcast %31 : vector<72x1xf32> to vector<72x128xf32>
    %35 = arith.subf %33, %34 : vector<72x128xf32>
    %cst_6 = arith.constant 0.000000e+00 : f32
    %36 = vector.broadcast %cst_6 : f32 to vector<72x128xf32>
    %37 = arith.maximumf %35, %36 : vector<72x128xf32>
    %38 = vector.broadcast %32 : vector<72x1xf32> to vector<72x128xf32>
    %39 = arith.mulf %37, %38 : vector<72x128xf32>
    %cst_7 = arith.constant dense<0.000000e+00> : vector<128xf32>
    %40 = vector.multi_reduction <add>, %39, %cst_7 [0] : vector<72x128xf32> to vector<128xf32>
    %41 = vector.shape_cast %40 : vector<128xf32> to vector<1x128xf32>
    %cst_8 = arith.constant 1.000000e+00 : f32
    %42 = vector.broadcast %cst_8 : f32 to vector<1x128xf32>
    %43 = arith.mulf %42, %12 : vector<1x128xf32>
    %cst_9 = arith.constant -7.590000e+01 : f32
    %44 = vector.broadcast %cst_9 : f32 to vector<1x128xf32>
    %45 = arith.addf %44, %43 : vector<1x128xf32>
    %46 = arith.addf %45, %41 : vector<1x128xf32>
    %47 = arith.subf %10, %30 : vector<1x128xf32>
    %48 = arith.subf %46, %11 : vector<1x128xf32>
    %49 = arith.subf %48, %8 : vector<1x128xf32>
    %50 = arith.subf %47, %9 : vector<1x128xf32>
    %51 = arith.addf %49, %50 : vector<1x128xf32>
    %52 = vector.extract_strided_slice %1 {offsets = [0, 2], sizes = [8, 1], strides = [1, 1]} : vector<80x8xf32> to vector<8x1xf32>
    %53 = vector.extract_strided_slice %1 {offsets = [0, 3], sizes = [8, 1], strides = [1, 1]} : vector<80x8xf32> to vector<8x1xf32>
    %54 = vector.extract_strided_slice %1 {offsets = [0, 4], sizes = [8, 1], strides = [1, 1]} : vector<80x8xf32> to vector<8x1xf32>
    %55 = vector.broadcast %51 : vector<1x128xf32> to vector<8x128xf32>
    %56 = vector.broadcast %52 : vector<8x1xf32> to vector<8x128xf32>
    %57 = arith.subf %55, %56 : vector<8x128xf32>
    %cst_10 = arith.constant 0.000000e+00 : f32
    %58 = vector.broadcast %cst_10 : f32 to vector<8x128xf32>
    %59 = arith.maximumf %57, %58 : vector<8x128xf32>
    %cst_11 = arith.constant -0.120312497 : f32
    %60 = vector.broadcast %cst_11 : f32 to vector<1x128xf32>
    %61 = arith.mulf %60, %51 : vector<1x128xf32>
    %cst_12 = arith.constant 2.968750e-01 : f32
    %62 = vector.broadcast %cst_12 : f32 to vector<1x128xf32>
    %63 = arith.addf %62, %61 : vector<1x128xf32>
    %64 = vector.broadcast %53 : vector<8x1xf32> to vector<8x128xf32>
    %65 = arith.mulf %59, %64 : vector<8x128xf32>
    %cst_13 = arith.constant dense<0.000000e+00> : vector<128xf32>
    %66 = vector.multi_reduction <add>, %65, %cst_13 [0] : vector<8x128xf32> to vector<128xf32>
    %67 = vector.shape_cast %66 : vector<128xf32> to vector<1x128xf32>
    %68 = arith.addf %63, %67 : vector<1x128xf32>
    %cst_14 = arith.constant -6.005860e-03 : f32
    %69 = vector.broadcast %cst_14 : f32 to vector<1x128xf32>
    %70 = arith.mulf %69, %51 : vector<1x128xf32>
    %cst_15 = arith.constant -1.000980e-02 : f32
    %71 = vector.broadcast %cst_15 : f32 to vector<1x128xf32>
    %72 = arith.addf %71, %70 : vector<1x128xf32>
    %73 = vector.broadcast %54 : vector<8x1xf32> to vector<8x128xf32>
    %74 = arith.mulf %59, %73 : vector<8x128xf32>
    %cst_16 = arith.constant dense<0.000000e+00> : vector<128xf32>
    %75 = vector.multi_reduction <add>, %74, %cst_16 [0] : vector<8x128xf32> to vector<128xf32>
    %76 = vector.shape_cast %75 : vector<128xf32> to vector<1x128xf32>
    %77 = arith.addf %72, %76 : vector<1x128xf32>
    %cst_17 = arith.constant 0.000000e+00 : f32
    %78 = vector.broadcast %cst_17 : f32 to vector<1x128xf32>
    %79 = arith.cmpf olt, %51, %78 : vector<1x128xf32>
    %cst_18 = arith.constant 0.000000e+00 : f32
    %80 = vector.broadcast %cst_18 : f32 to vector<1x128xf32>
    %81 = arith.cmpf olt, %49, %80 : vector<1x128xf32>
    %82 = arith.ori %79, %81 : vector<1x128xi1>
    %cst_19 = arith.constant 3.800000e+01 : f32
    %83 = vector.broadcast %cst_19 : f32 to vector<1x128xf32>
    %84 = arith.cmpf oge, %14, %83 : vector<1x128xf32>
    %85 = arith.ori %82, %84 : vector<1x128xi1>
    %cst_20 = arith.constant 0.000000e+00 : f32
    %86 = vector.broadcast %cst_20 : f32 to vector<1x128xf32>
    %87 = arith.cmpf one, %49, %86 : vector<1x128xf32>
    %88 = arith.ori %85, %87 : vector<1x128xi1>
    %cst_21 = arith.constant 0.000000e+00 : f32
    %89 = vector.broadcast %cst_21 : f32 to vector<1x128xf32>
    %90 = arith.select %88, %89, %77 : vector<1x128xi1>, vector<1x128xf32>
    %91 = arith.mulf %90, %51 : vector<1x128xf32>
    %cst_22 = arith.constant 3.000000e+01 : f32
    %92 = vector.broadcast %cst_22 : f32 to vector<1x128xf32>
    %93 = arith.addf %92, %91 : vector<1x128xf32>
    %94 = arith.mulf %68, %51 : vector<1x128xf32>
    %95 = arith.addf %94, %93 : vector<1x128xf32>
    %c0_23 = arith.constant 0 : index
    %c0_24 = arith.constant 0 : index
    %96 = vector.load %arg4[%c0_23, %c0_24] : memref<256x8xf32, #tpu.memory_space<vmem>>, vector<256x8xf32>
    %cst_25 = arith.constant dense<0.000000e+00> : vector<256x128xf32>
    %97 = tpu.matmul %96, %7, %cst_25 {dimension_numbers = #tpu.dot_dimension_numbers<[1], [0], [0], [1], [0, 0, 1, 1], [], []>} : vector<256x8xf32>, vector<8x128xf32>, vector<256x128xf32> -> vector<256x128xf32>
    %98 = arith.truncf %97 : vector<256x128xf32> to vector<256x128xbf16>
    %99 = math.tanh %98 : vector<256x128xbf16>
    %c0_26 = arith.constant 0 : index
    %c0_27 = arith.constant 0 : index
    %100 = vector.load %arg5[%c0_26, %c0_27] : memref<256x256xbf16, #tpu.memory_space<vmem>>, vector<256x256xbf16>
    %cst_28 = arith.constant dense<0.000000e+00> : vector<256x128xf32>
    %101 = tpu.matmul %100, %99, %cst_28 {dimension_numbers = #tpu.dot_dimension_numbers<[1], [0], [0], [1], [0, 0, 1, 1], [], []>} : vector<256x256xbf16>, vector<256x128xbf16>, vector<256x128xf32> -> vector<256x128xf32>
    %c0_29 = arith.constant 0 : index
    %c0_30 = arith.constant 0 : index
    %102 = vector.load %arg6[%c0_29, %c0_30] : memref<256x1xf32, #tpu.memory_space<vmem>>, vector<256x1xf32>
    %103 = vector.broadcast %102 : vector<256x1xf32> to vector<256x128xf32>
    %104 = arith.addf %101, %103 : vector<256x128xf32>
    %105 = math.tanh %104 : vector<256x128xf32>
    %c1 = arith.constant 1 : index
    %106 = memref.load %arg1[%c1] : memref<2xf32, #tpu.memory_space<smem>>
    %c0_31 = arith.constant 0 : index
    %c0_32 = arith.constant 0 : index
    %107 = vector.load %arg7[%c0_31, %c0_32] : memref<256x1xf32, #tpu.memory_space<vmem>>, vector<256x1xf32>
    %108 = vector.broadcast %107 : vector<256x1xf32> to vector<256x128xf32>
    %109 = arith.mulf %105, %108 : vector<256x128xf32>
    %cst_33 = arith.constant dense<0.000000e+00> : vector<128xf32>
    %110 = vector.multi_reduction <add>, %109, %cst_33 [0] : vector<256x128xf32> to vector<128xf32>
    %111 = vector.shape_cast %110 : vector<128xf32> to vector<1x128xf32>
    %112 = vector.broadcast %106 : f32 to vector<1x128xf32>
    %113 = arith.addf %111, %112 : vector<1x128xf32>
    %c0_34 = arith.constant 0 : index
    %114 = memref.load %arg1[%c0_34] : memref<2xf32, #tpu.memory_space<smem>>
    %115 = arith.addf %95, %113 : vector<1x128xf32>
    %116 = vector.broadcast %114 : f32 to vector<1x128xf32>
    %117 = arith.mulf %115, %116 : vector<1x128xf32>
    %118 = arith.addf %14, %117 : vector<1x128xf32>
    %cst_35 = arith.constant 1.200000e+01 : f32
    %cst_36 = arith.constant 1.000000e+02 : f32
    %119 = vector.broadcast %cst_35 : f32 to vector<1x128xf32>
    %120 = arith.maximumf %119, %118 : vector<1x128xf32>
    %121 = vector.broadcast %cst_36 : f32 to vector<1x128xf32>
    %122 = arith.minimumf %121, %120 : vector<1x128xf32>
    %c0_37 = arith.constant 0 : index
    %c0_38 = arith.constant 0 : index
    %123 = vector.load %arg8[%c0_37, %c0_38] : memref<1x128xf32, #tpu.memory_space<vmem>>, vector<1x128xf32>
    tpu.vector_store %arg8[%c0_37, %c0_38], %122 {strides = array<i32>} : memref<1x128xf32, #tpu.memory_space<vmem>>, vector<1x128xf32>,
    return
  }
  func.func @transform_0(%arg0: i32) -> i32 {
    %c0_i32 = arith.constant 0 : i32
    %c0_i32_0 = arith.constant 0 : i32
    return %c0_i32 : i32
  }
  func.func @transform_1(%arg0: i32) -> (i32, i32) {
    %c0_i32 = arith.constant 0 : i32
    %c0_i32_0 = arith.constant 0 : i32
    return %c0_i32, %arg0 : i32, i32
  }
  func.func @transform_2(%arg0: i32) -> (i32, i32) {
    %c0_i32 = arith.constant 0 : i32
    %c0_i32_0 = arith.constant 0 : i32
    %c0_i32_1 = arith.constant 0 : i32
    return %c0_i32, %c0_i32_0 : i32, i32
  }
  func.func @transform_3(%arg0: i32) -> (i32, i32) {
    %c0_i32 = arith.constant 0 : i32
    %c0_i32_0 = arith.constant 0 : i32
    %c0_i32_1 = arith.constant 0 : i32
    return %c0_i32, %c0_i32_0 : i32, i32
  }
  func.func @transform_4(%arg0: i32) -> (i32, i32) {
    %c0_i32 = arith.constant 0 : i32
    %c0_i32_0 = arith.constant 0 : i32
    %c0_i32_1 = arith.constant 0 : i32
    return %c0_i32, %c0_i32_0 : i32, i32
  }
  func.func @transform_5(%arg0: i32) -> (i32, i32) {
    %c0_i32 = arith.constant 0 : i32
    %c0_i32_0 = arith.constant 0 : i32
    %c0_i32_1 = arith.constant 0 : i32
    return %c0_i32, %c0_i32_0 : i32, i32
  }
  func.func @transform_6(%arg0: i32) -> (i32, i32) {
    %c0_i32 = arith.constant 0 : i32
    %c0_i32_0 = arith.constant 0 : i32
    %c0_i32_1 = arith.constant 0 : i32
    return %c0_i32, %c0_i32_0 : i32, i32
  }
  func.func @transform_7(%arg0: i32) -> (i32, i32) {
    %c0_i32 = arith.constant 0 : i32
    %c0_i32_0 = arith.constant 0 : i32
    return %c0_i32, %arg0 : i32, i32
  }
}

</mosaic_0001>

<bundles_post_ra>
// kernel: my_model_forward.1
= control target key start
LH: loop header
LB: loop body
LE: loop exit
PB: predicated region body
PF: predicated region fallthrough
CT: control target
= control target key end

     0   :  { %12 = vsyncpa [#allocation3], 0  ;;  %s2795_s0 = inlined_call_operand.vmem [shape: f32[2], index: 0, kind: input, shape index: {}]   ;;  %s2796_s1 = inlined_call_operand.vmem [shape: f32[8,128], index: 1, kind: input, shape index: {}]   ;;  %s2797_s2 = inlined_call_operand.vmem [shape: f32[80,8], index: 2, kind: input, shape index: {}]   ;;  %s2798_s3 = inlined_call_operand.vmem [shape: f32[256,8], index: 3, kind: input, shape index: {}]   ;;  %s2799_s4 = inlined_call_operand.vmem [shape: bf16[256,256], index: 4, kind: input, shape index: {}]   ;;  %s2800_s5 = inlined_call_operand.vmem [shape: f32[256,1], index: 5, kind: input, shape index: {}]   ;;  %s2801_s6 = inlined_call_operand.vmem [shape: f32[256,1], index: 6, kind: input, shape index: {}]   ;;  %s2802_s7 = inlined_call_operand.vmem [shape: f32[1,128], index: 7, kind: output, shape index: {}]  }
   0x1   :  { %s19_s26 = sshll.u32 %s2795_s0, 4  ;;  %s20_s26 = int_to_ptr.vmem [resolvable:$true] %s19_s26 }
   0x2   :  { %s1978_s27 = scalar_lea.vmem %s20_s26, 16  ;;  %p1983_p1 = scmp.lt.s32.totalorder %s20_s26, %s20_s26 }
   0x3   :  { %p1979_p0 = scmp.ne.s32.totalorder %s20_s26, %s1978_s27  ;;  %p1984_p2 = scmp.lt.s32.totalorder %s1978_s27, %s1978_s27 }
   0x5   :  { %p1985_p3 = por %p1984_p2, %p1983_p1 }
   0x7   :  { %p1986_p4 = pnand %p1985_p3, %p1979_p0 }
   0x9   :  { %1989 = shalt.err (!%p1986_p4)
}
   0xa   :  { %s1992_s28 = smov [#allocation2]  }
   0xb   :  { %22 = dma.vmem_to_smem %s20_s26, 16, %s1992_s28, [#allocation3]  }
   0xc   :  { %1990 = dma.done.wait [#allocation3], 16  }
   0xd   :  { %1991 = vsyncadd [#allocation3], 4294967280 }
   0xe   :  { %38 = sfence }
   0xf   :  { %v41_v0 = vld [vmem:[%s2797_s2] sm:$0xff]  ;;  %v1993_v1 = vmov 0   ;;  %v1994_v2 = vmov 5   ;;  %v42_v3 = vld [vmem:[%s2797_s2 + $0x8] sm:$0xff]  ;;  %vm327_vm0 = vcmask 64512   ;;  %v1995_v5 = vmov 6  }
  0x10   :  { %1824 = vset.pattern.permute.xlu1 %v1993_v1  ;;  %1822 = vset.pattern.permute.xlu0 %v1994_v2  ;;  %v295_v4 = vld [vmem:[%s2798_s3] sm:$0xff]  ;;  %v43_v6 = vld [vmem:[%s2797_s2 + $0x10] sm:$0xff]  ;;  %v1996_v8 = vmov 1   ;;  %v46_v9 = vld [vmem:[%s2797_s2 + $0x28] sm:$0xff]  ;;  %v1997_v11 = vmov 2   ;;  %v1998_v15 = vmov 3   ;;  %v61_v17 = vlaneseq }
  0x11   :  { %66 = vperm.xlu1 %1824, %v41_v0   ;;  %52 = vperm.xlu0 %1822, %v41_v0   ;;  %v45_v7 = vld [vmem:[%s2797_s2 + $0x20] sm:$0xff]  ;;  %v47_v10 = vld [vmem:[%s2797_s2 + $0x30] sm:$0xff]  ;;  %v44_v12 = vld [vmem:[%s2797_s2 + $0x18] sm:$0xff]  ;;  %v1999_v16 = vmov 4   ;;  %s1522_s8 = sld [smem:[#allocation2]] }
  0x12   :  { %1750 = vmatprep.mubr.msk.f32.mxu0 %vm327_vm0, %v295_v4  ;;  %v49_v13 = vld [vmem:[%s2797_s2 + $0x40] sm:$0xff]  ;;  %v48_v14 = vld [vmem:[%s2797_s2 + $0x38] sm:$0xff]  ;;  %v2078_v20 = vshrl.u32 %v61_v17, 7  ;;  %v296_v28 = vld [vmem:[%s2798_s3 + $0x8] sm:$0xff] }
  0x13   :  { %v40_v21 = vld [vmem:[%s2796_s1] sm:$0xff]  ;;  %v297_v32 = vld [vmem:[%s2798_s3 + $0x10] sm:$0xff]  ;;  %v298_v36 = vld [vmem:[%s2798_s3 + $0x18] sm:$0xff] }
  0x14   :  { %v63_v24 = vsub.s32 5, %v2078_v20  ;;  %v164_v25 = vsub.s32 4, %v2078_v20  ;;  %v299_v40 = vld [vmem:[%s2798_s3 + $0x20] sm:$0xff]  ;;  %v300_v48 = vld [vmem:[%s2798_s3 + $0x28] sm:$0xff]  ;;  %v301_v52 = vld [vmem:[%s2798_s3 + $0x30] sm:$0xff] }
  0x15   :  { %71 = vperm.xlu1 %1824, %v42_v3   ;;  %1823 = vset.pattern.permute.xlu0 %v1995_v5  ;;  %v302_v56 = vld [vmem:[%s2798_s3 + $0x38] sm:$0xff]  ;;  %v303_v61 = vld [vmem:[%s2798_s3 + $0x40] sm:$0xff] }
  0x16   :  { %57 = vperm.xlu0 %1823, %v41_v0  }
  0x19   :  { %76 = vperm.xlu1 %1824, %v43_v6  }
  0x1a   :  { %1826 = vset.pattern.permute.xlu0 %v1996_v8 }
  0x1b   :  { %118 = vperm.xlu0 %1826, %v42_v3   ;;  %v304_v3 = vld [vmem:[%s2798_s3 + $0x48] sm:$0xff] }
  0x1d   :  { %86 = vperm.xlu1 %1824, %v45_v7  }
  0x1f   :  { %130 = vperm.xlu0 %1826, %v45_v7  }
  0x21   :  { %91 = vperm.xlu1 %1824, %v46_v9  }
  0x23   :  { %138 = vperm.xlu0 %1826, %v47_v10  }
  0x25   :  { %1825 = vset.pattern.permute.xlu1 %v1996_v8 }
  0x26   :  { %114 = vperm.xlu1 %1825, %v41_v0  }
  0x27   :  { %1829 = vset.pattern.permute.xlu0 %v1997_v11 }
  0x28   :  { %247 = vperm.xlu0 %1829, %v41_v0  }
  0x2a   :  { %122 = vperm.xlu1 %1825, %v43_v6  }
  0x2c   :  { %1830 = vset.pattern.permute.xlu0 %v1993_v1 }
  0x2d   :  { %81 = vperm.xlu0 %1830, %v44_v12  }
  0x2e   :  { %126 = vperm.xlu1 %1825, %v44_v12   ;;  %v306_v12 = vld [vmem:[%s2798_s3 + $0x58] sm:$0xff] }
  0x31   :  { %96 = vperm.xlu0 %1830, %v47_v10  }
  0x32   :  { %134 = vperm.xlu1 %1825, %v46_v9  }
  0x35   :  { %173 = vperm.xlu0 %1830, %v49_v13  }
  0x36   :  { %1827 = vset.pattern.permute.xlu1 %v1993_v1 }
  0x37   :  { %168 = vperm.xlu1 %1827, %v48_v14  }
  0x3b   :  { %1828 = vset.pattern.permute.xlu1 %v1996_v8  ;;  %v305_v8 = vld [vmem:[%s2798_s3 + $0x50] sm:$0xff] }
  0x3c   :  { %195 = vperm.xlu1 %1828, %v48_v14  }
  0x40   :  { %199 = vperm.xlu1 %1828, %v49_v13  }
  0x44   :  { %1831 = vset.pattern.permute.xlu1 %v1998_v15 }
  0x45   :  { %255 = vperm.xlu1 %1831, %v41_v0  }
  0x49   :  { %1832 = vset.pattern.permute.xlu1 %v1999_v16 }
  0x4a   :  { %269 = vperm.xlu1 %1832, %v41_v0  }
  0x4e   :  { %1833 = vset.pattern.permute.xlu1 %v1993_v1 }
  0x8c   :  { %v67_v18 = vpop.permute.xlu1 %66  ;;  %v53_v19 = vpop.permute.xlu0 %52 }
  0x8d   :  { %v55_v22 = vmax.f32 %v40_v21, %v53_v19 }
  0x90   :  { %v72_v23 = vpop.permute.xlu1 %71 }
  0x91   :  { %v58_v26 = vpop.permute.xlu0 %57 }
  0x92   :  { %v2085_v27 = vmin.f32 %v55_v22, %v58_v26  ;;  %v308_v26 = vld [vmem:[%s2798_s3 + $0x68] sm:$0xff] }
  0x94   :  { %2804 = vst [vmem:[#allocation5_spill] sm:$0xff] %v2085_v27  ;;  %v77_v29 = vpop.permute.xlu1 %76  ;;  %v2091_v30 = vrot.slane %v2085_v27, %v63_v24  ;;  %v2096_v31 = vrot.slane %v2085_v27, %v164_v25  ;;  %1748 = vmatprep.subr.mxu0 %v2085_v27  ;;  %vm283_vm1 = vcmp.ge.f32.partialorder %v2085_v27, 38.0 }
  0x95   :  { %1749 = vmatpush3.msra.mxu0 %v2085_v27 }
  0x96   :  { %1751 = vmatmul.mubr.msk.f32.vlgmr.msra.gmra.mxu0 %vm327_vm0, %v296_v28  ;;  %v119_v33 = vpop.permute.xlu0 %118  ;;  %v100_v34 = vsub.f32 %v2091_v30, %v72_v23  ;;  %v177_v35 = vsub.f32 %v2096_v31, %v72_v23  ;;  %v99_v50 = vsub.f32 %v2091_v30, %v67_v18  ;;  %v176_v51 = vsub.f32 %v2096_v31, %v67_v18  ;;  %v307_v18 = vld [vmem:[%s2798_s3 + $0x60] sm:$0xff] }
  0x97   :  { %1753 = vmatprep.mubr.msk.f32.mxu0 %vm327_vm0, %v297_v32  ;;  %v101_v57 = vsub.f32 %v2091_v30, %v77_v29  ;;  %v178_v58 = vsub.f32 %v2096_v31, %v77_v29 }
  0x98   :  { %v87_v37 = vpop.permute.xlu1 %86  ;;  %v107_v38 = vmax.f32 %v100_v34, 0.0  ;;  %v186_v39 = vmax.f32 %v177_v35, 0.0  ;;  %v106_v59 = vmax.f32 %v99_v50, 0.0  ;;  %v185_v60 = vmax.f32 %v176_v51, 0.0 }
  0x99   :  { %v103_v41 = vsub.f32 %v2091_v30, %v87_v37  ;;  %v180_v42 = vsub.f32 %v2096_v31, %v87_v37  ;;  %v108_v4 = vmax.f32 %v101_v57, 0.0  ;;  %v187_v5 = vmax.f32 %v178_v58, 0.0  ;;  %v312_v58 = vld [vmem:[%s2798_s3 + $0x88] sm:$0xff] }
  0x9a   :  { %v142_v43 = vmul.f32 %v119_v33, %v107_v38  ;;  %v203_v44 = vmul.f32 %v186_v39, %v119_v33  ;;  %1754 = vmatmul.mubr.msk.f32.gmra.mxu0 %vm327_vm0, %v298_v36  ;;  %v131_v45 = vpop.permute.xlu0 %130  ;;  %v309_v33 = vld [vmem:[%s2798_s3 + $0x70] sm:$0xff] }
  0x9b   :  { %v110_v46 = vmax.f32 %v103_v41, 0.0  ;;  %v189_v47 = vmax.f32 %v180_v42, 0.0  ;;  %1756 = vmatprep.mubr.msk.f32.mxu0 %vm327_vm0, %v299_v40 }
  0x9c   :  { %v92_v49 = vpop.permute.xlu1 %91 }
  0x9d   :  { %v2125_v53 = vmul.f32 %v131_v45, %v110_v46  ;;  %v2127_v54 = vmul.f32 %v189_v47, %v131_v45  ;;  %v104_v13 = vsub.f32 %v2091_v30, %v92_v49  ;;  %v181_v14 = vsub.f32 %v2096_v31, %v92_v49  ;;  %v310_v45 = vld [vmem:[%s2798_s3 + $0x78] sm:$0xff] }
  0x9e   :  { %1757 = vmatmul.mubr.msk.f32.gmra.mxu0 %vm327_vm0, %v300_v48  ;;  %v139_v55 = vpop.permute.xlu0 %138 }
  0x9f   :  { %1759 = vmatprep.mubr.msk.f32.mxu0 %vm327_vm0, %v301_v52  ;;  %v111_v28 = vmax.f32 %v104_v13, 0.0  ;;  %v190_v29 = vmax.f32 %v181_v14, 0.0  ;;  %v318_v14 = vld [vmem:[%s2798_s3 + $0xb8] sm:$0xff] }
  0xa1   :  { %v115_v62 = vpop.permute.xlu1 %114 }
  0xa2   :  { %v141_v63 = vmul.f32 %v115_v62, %v106_v59  ;;  %v202_v0 = vmul.f32 %v185_v60, %v115_v62  ;;  %1760 = vmatmul.mubr.msk.f32.gmra.mxu0 %vm327_vm0, %v302_v56 }
  0xa3   :  { %v2140_v2 = vpop.permute.xlu0 %247  ;;  %1762 = vmatprep.mubr.msk.f32.mxu0 %vm327_vm0, %v303_v61 }
  0xa4   :  { %v148_v6 = vadd.f32 %v142_v43, %v141_v63  ;;  %v211_v7 = vadd.f32 %v203_v44, %v202_v0  ;;  %v314_v63 = vld [vmem:[%s2798_s3 + $0x98] sm:$0xff] }
  0xa5   :  { %v123_v9 = vpop.permute.xlu1 %122 }
  0xa6   :  { %v143_v10 = vmul.f32 %v123_v9, %v108_v4  ;;  %v204_v11 = vmul.f32 %v187_v5, %v123_v9  ;;  %1763 = vmatmul.mubr.msk.f32.gmra.mxu0 %vm327_vm0, %v304_v3  ;;  %v315_v3 = vld [vmem:[%s2798_s3 + $0xa0] sm:$0xff] }
  0xa7   :  { %1765 = vmatprep.mubr.msk.f32.mxu0 %vm327_vm0, %v305_v8  ;;  %v316_v8 = vld [vmem:[%s2798_s3 + $0xa8] sm:$0xff] }
  0xa8   :  { %v149_v15 = vadd.f32 %v148_v6, %v143_v10  ;;  %v212_v16 = vadd.f32 %v211_v7, %v204_v11  ;;  %v82_v17 = vpop.permute.xlu0 %81  ;;  %v317_v10 = vld [vmem:[%s2798_s3 + $0xb0] sm:$0xff] }
  0xa9   :  { %v102_v19 = vsub.f32 %v2091_v30, %v82_v17  ;;  %v179_v21 = vsub.f32 %v2096_v31, %v82_v17  ;;  %v127_v22 = vpop.permute.xlu1 %126 }
  0xaa   :  { %1766 = vmatmul.mubr.msk.f32.gmra.mxu0 %vm327_vm0, %v306_v12 }
  0xab   :  { %v109_v23 = vmax.f32 %v102_v19, 0.0  ;;  %v188_v24 = vmax.f32 %v179_v21, 0.0  ;;  %1768 = vmatprep.mubr.msk.f32.mxu0 %vm327_vm0, %v307_v18  ;;  %v160_v18 = vadd.f32 -75.9, %v2085_v27 }
  0xac   :  { %v97_v32 = vpop.permute.xlu0 %96 }
  0xad   :  { %v144_v34 = vmul.f32 %v127_v22, %v109_v23  ;;  %v205_v35 = vmul.f32 %v188_v24, %v127_v22  ;;  %v105_v36 = vsub.f32 %v2091_v30, %v97_v32  ;;  %v182_v37 = vsub.f32 %v2096_v31, %v97_v32  ;;  %v135_v38 = vpop.permute.xlu1 %134  ;;  %v311_v30 = vld [vmem:[%s2798_s3 + $0x80] sm:$0xff]  ;;  %v320_v22 = vld [vmem:[%s2798_s3 + $0xc8] sm:$0xff]  ;;  %v321_v24 = vld [vmem:[%s2798_s3 + $0xd0] sm:$0xff] }
  0xae   :  { %v146_v39 = vmul.f32 %v135_v38, %v111_v28  ;;  %v207_v40 = vmul.f32 %v190_v29, %v135_v38  ;;  %1769 = vmatmul.mubr.msk.f32.gmra.mxu0 %vm327_vm0, %v308_v26  ;;  %v322_v29 = vld [vmem:[%s2798_s3 + $0xd8] sm:$0xff] }
  0xaf   :  { %v150_v41 = vadd.f32 %v149_v15, %v144_v34  ;;  %v213_v42 = vadd.f32 %v212_v16, %v205_v35  ;;  %v112_v43 = vmax.f32 %v105_v36, 0.0  ;;  %v191_v44 = vmax.f32 %v182_v37, 0.0  ;;  %1771 = vmatprep.mubr.msk.f32.mxu0 %vm327_vm0, %v309_v33  ;;  %v319_v16 = vld [vmem:[%s2798_s3 + $0xc0] sm:$0xff]  ;;  %v324_v37 = vld [vmem:[%s2798_s3 + $0xe8] sm:$0xff] }
  0xb0   :  { %v174_v56 = vpop.permute.xlu0 %173  ;;  %v323_v34 = vld [vmem:[%s2798_s3 + $0xe0] sm:$0xff]  ;;  %v231_v36 = vrot.slane %v2085_v27, 7 }
  0xb1   :  { %v147_v46 = vmul.f32 %v139_v55, %v112_v43  ;;  %v208_v47 = vmul.f32 %v191_v44, %v139_v55  ;;  %v151_v48 = vadd.f32 %v150_v41, %v2125_v53  ;;  %v214_v49 = vadd.f32 %v213_v42, %v2127_v54  ;;  %v313_v53 = vld [vmem:[%s2798_s3 + $0x90] sm:$0xff]  ;;  %v326_v44 = vld [vmem:[%s2798_s3 + $0xf8] sm:$0xff] }
  0xb2   :  { %v169_v50 = vpop.permute.xlu1 %168  ;;  %1772 = vmatmul.mubr.msk.f32.gmra.mxu0 %vm327_vm0, %v310_v45  ;;  %v184_v60 = vsub.f32 %v2096_v31, %v174_v56  ;;  %v234_v42 = vrot.slane %v2085_v27, 4  ;;  %v284_v43 = vsel %vm283_vm1, 1, %v1993_v1 }
  0xb3   :  { %v152_v51 = vadd.f32 %v151_v48, %v146_v39  ;;  %v215_v52 = vadd.f32 %v214_v49, %v207_v40  ;;  %v183_v57 = vsub.f32 %v2096_v31, %v169_v50  ;;  %1774 = vmatprep.mubr.msk.f32.mxu0 %vm327_vm0, %v311_v30  ;;  %v325_v40 = vld [vmem:[%s2798_s3 + $0xf0] sm:$0xff] }
  0xb4   :  { %v193_v5 = vmax.f32 %v184_v60, 0.0 }
  0xb5   :  { %v153_v55 = vadd.f32 %v152_v51, %v147_v46  ;;  %v192_v54 = vmax.f32 %v183_v57, 0.0  ;;  %v216_v59 = vadd.f32 %v215_v52, %v208_v47  ;;  %v285_v47 = vrot.slane %v284_v43, 3  ;;  %v1262_v43 = vld [vmem:[%s2801_s6 + $0x18] sm:$0xff]  ;;  %v1272_v51 = vld [vmem:[%s2801_s6 + $0x68] sm:$0xff] }
  0xb6   :  { %1775 = vmatmul.mubr.msk.f32.gmra.mxu0 %vm327_vm0, %v312_v58 }
  0xb7   :  { %v154_v61 = vrot.slane %v153_v55, 4  ;;  %v196_v62 = vpop.permute.xlu1 %195  ;;  %1777 = vmatprep.mubr.msk.f32.mxu0 %vm327_vm0, %v313_v53  ;;  %vm286_vm5 = vcmp.ne.s32.totalorder %v285_v47, 0  ;;  %v1261_v47 = vld [vmem:[%s2801_s6 + $0x10] sm:$0xff] }
  0xb8   :  { %v209_v0 = vmul.f32 %v196_v62, %v192_v54 }
  0xb9   :  { %v155_v4 = vadd.f32 %v154_v61, %v153_v55 }
  0xba   :  { %v217_v6 = vadd.f32 %v216_v59, %v209_v0  ;;  %1778 = vmatmul.mubr.msk.f32.gmra.mxu0 %vm327_vm0, %v314_v63 }
  0xbb   :  { %v156_v31 = vrot.slane %v155_v4, 2  ;;  %v200_v7 = vpop.permute.xlu1 %199  ;;  %1780 = vmatprep.mubr.msk.f32.mxu0 %vm327_vm0, %v315_v3 }
  0xbc   :  { %v210_v9 = vmul.f32 %v200_v7, %v193_v5 }
  0xbd   :  { %v157_v11 = vadd.f32 %v156_v31, %v155_v4 }
  0xbe   :  { %v218_v12 = vadd.f32 %v217_v6, %v210_v9  ;;  %1781 = vmatmul.mubr.msk.f32.gmra.mxu0 %vm327_vm0, %v316_v8 }
  0xbf   :  { %v158_v13 = vrot.slane %v157_v11, 1  ;;  %1783 = vmatprep.mubr.msk.f32.mxu0 %vm327_vm0, %v317_v10 }
  0xc0   :  { %v219_v15 = vrot.slane %v218_v12, 4  ;;  %v256_v46 = vpop.permute.xlu1 %255 }
  0xc1   :  { %v159_v17 = vadd.f32 %v158_v13, %v157_v11  ;;  %v716_v13 = vld [vmem:[%s2800_s5 + $0x18] sm:$0xff] }
  0xc2   :  { %v220_v19 = vadd.f32 %v219_v15, %v218_v12  ;;  %1784 = vmatmul.mubr.msk.f32.gmra.mxu0 %vm327_vm0, %v318_v14  ;;  %v713_v12 = vld [vmem:[%s2800_s5] sm:$0xff]  ;;  %v718_v14 = vld [vmem:[%s2800_s5 + $0x28] sm:$0xff] }
  0xc3   :  { %v161_v21 = vadd.f32 %v160_v18, %v159_v17  ;;  %1786 = vmatprep.mubr.msk.f32.mxu0 %vm327_vm0, %v319_v16  ;;  %747 = vperm.xlu0 %1830, %v713_v12   ;;  %v714_v15 = vld [vmem:[%s2800_s5 + $0x8] sm:$0xff]  ;;  %v720_v16 = vld [vmem:[%s2800_s5 + $0x38] sm:$0xff]  ;;  %v715_v17 = vld [vmem:[%s2800_s5 + $0x10] sm:$0xff] }
  0xc4   :  { %v221_v23 = vrot.slane %v220_v19, 2  ;;  %752 = vperm.xlu1 %1833, %v714_v15  }
  0xc5   :  { %v227_v26 = vrot.slane %v161_v21, 3  ;;  %v270_v50 = vpop.permute.xlu1 %269  ;;  %v724_v21 = vld [vmem:[%s2800_s5 + $0x58] sm:$0xff] }
  0xc6   :  { %v222_v28 = vadd.f32 %v221_v23, %v220_v19  ;;  %1787 = vmatmul.mubr.msk.f32.gmra.mxu0 %vm327_vm0, %v320_v22  ;;  %v717_v19 = vld [vmem:[%s2800_s5 + $0x20] sm:$0xff]  ;;  %v719_v22 = vld [vmem:[%s2800_s5 + $0x30] sm:$0xff]  ;;  %v726_v23 = vld [vmem:[%s2800_s5 + $0x68] sm:$0xff] }
  0xc7   :  { %1789 = vmatprep.mubr.msk.f32.mxu0 %vm327_vm0, %v321_v24  ;;  %v229_v33 = vsub.f32 %v2085_v27, %v227_v26  ;;  %762 = vperm.xlu0 %1830, %v716_v13   ;;  %v721_v24 = vld [vmem:[%s2800_s5 + $0x40] sm:$0xff]  ;;  %v728_v26 = vld [vmem:[%s2800_s5 + $0x78] sm:$0xff]  ;;  %v742_v13 = vld [vmem:[%s2800_s5 + $0xe8] sm:$0xff] }
  0xc8   :  { %v223_v32 = vrot.slane %v222_v28, 1  ;;  %757 = vperm.xlu1 %1833, %v715_v17  }
  0xc9   :  { %v237_v39 = vsub.f32 %v229_v33, %v231_v36  ;;  %v732_v33 = vld [vmem:[%s2800_s5 + $0x98] sm:$0xff] }
  0xca   :  { %v224_v35 = vadd.f32 %v223_v32, %v222_v28  ;;  %1790 = vmatmul.mubr.msk.f32.gmra.mxu0 %vm327_vm0, %v322_v29  ;;  %v723_v28 = vld [vmem:[%s2800_s5 + $0x50] sm:$0xff]  ;;  %v730_v29 = vld [vmem:[%s2800_s5 + $0x88] sm:$0xff]  ;;  %v725_v32 = vld [vmem:[%s2800_s5 + $0x60] sm:$0xff] }
  0xcb   :  { %1792 = vmatprep.mubr.msk.f32.mxu0 %vm327_vm0, %v323_v34  ;;  %v239_v30 = vrot.slane %v237_v39, 6  ;;  %772 = vperm.xlu0 %1830, %v718_v14   ;;  %v727_v34 = vld [vmem:[%s2800_s5 + $0x70] sm:$0xff]  ;;  %v738_v39 = vld [vmem:[%s2800_s5 + $0xc8] sm:$0xff] }
  0xcc   :  { %v225_v38 = vadd.f32 %v224_v35, %v160_v18  ;;  %v722_v18 = vld [vmem:[%s2800_s5 + $0x48] sm:$0xff]  ;;  %767 = vperm.xlu1 %1833, %v717_v19  }
  0xcd   :  { %v734_v35 = vld [vmem:[%s2800_s5 + $0xa8] sm:$0xff] }
  0xce   :  { %v233_v41 = vsub.f32 %v225_v38, %v231_v36  ;;  %1793 = vmatmul.mubr.msk.f32.gmra.mxu0 %vm327_vm0, %v324_v37  ;;  %v729_v36 = vld [vmem:[%s2800_s5 + $0x80] sm:$0xff]  ;;  %v736_v37 = vld [vmem:[%s2800_s5 + $0xb8] sm:$0xff]  ;;  %v731_v38 = vld [vmem:[%s2800_s5 + $0x90] sm:$0xff] }
  0xcf   :  { %1795 = vmatprep.mubr.msk.f32.mxu0 %vm327_vm0, %v325_v40  ;;  %782 = vperm.xlu0 %1830, %v720_v16   ;;  %v733_v40 = vld [vmem:[%s2800_s5 + $0xa0] sm:$0xff]  ;;  %v1284_v16 = vld [vmem:[%s2801_s6 + $0xc8] sm:$0xff] }
  0xd0   :  { %v236_v45 = vsub.f32 %v233_v41, %v234_v42  ;;  %777 = vperm.xlu1 %1833, %v719_v22   ;;  %v1260_v41 = vld [vmem:[%s2801_s6 + $0x8] sm:$0xff]  ;;  %v735_v42 = vld [vmem:[%s2800_s5 + $0xb0] sm:$0xff]  ;;  %v1286_v22 = vld [vmem:[%s2801_s6 + $0xd8] sm:$0xff] }
  0xd2   :  { %v241_v48 = vadd.f32 %v239_v30, %v236_v45  ;;  %1796 = vmatmul.mubr.msk.f32.gmra.mxu0 %vm327_vm0, %v326_v44  ;;  %vm281_vm3 = vcmp.lt.f32.partialorder %v236_v45, 0.0  ;;  %vm288_vm7 = vcmp.ne.f32.partialorder %v236_v45, 0.0  ;;  %v737_v44 = vld [vmem:[%s2800_s5 + $0xc0] sm:$0xff]  ;;  %v1264_v45 = vld [vmem:[%s2801_s6 + $0x28] sm:$0xff] }
  0xd3   :  { %792 = vperm.xlu0 %1830, %v722_v18   ;;  %v1259_v30 = vld [vmem:[%s2801_s6] sm:$0xff]  ;;  %v743_v18 = vld [vmem:[%s2800_s5 + $0xf0] sm:$0xff] }
  0xd4   :  { %v245_v49 = vrot.slane %v241_v48, %v164_v25  ;;  %vm280_vm2 = vcmp.lt.f32.partialorder %v241_v48, 0.0  ;;  %v252_v59 = vmul.f32 -0.1203125, %v241_v48  ;;  %v266_v61 = vmul.f32 -0.00600586, %v241_v48  ;;  %787 = vperm.xlu1 %1833, %v721_v24   ;;  %v744_v24 = vld [vmem:[%s2800_s5 + $0xf8] sm:$0xff] }
  0xd5   :  { %vm282_vm4 = vmor %vm280_vm2, %vm281_vm3 }
  0xd6   :  { %v250_v1 = vsub.f32 %v245_v49, %v2140_v2  ;;  %vm287_vm6 = vmor %vm282_vm4, %vm286_vm5  ;;  %v253_v0 = vadd.f32 0.296875, %v252_v59  ;;  %v267_v4 = vadd.f32 -0.0100098, %v266_v61  ;;  %v1263_v49 = vld [vmem:[%s2801_s6 + $0x20] sm:$0xff]  ;;  %v1278_v59 = vld [vmem:[%s2801_s6 + $0x98] sm:$0xff] }
  0xd7   :  { %vm2254_vm8 = vmor %vm287_vm6, %vm288_vm7  ;;  %802 = vperm.xlu0 %1830, %v724_v21   ;;  %v1279_v61 = vld [vmem:[%s2801_s6 + $0xa0] sm:$0xff] }
  0xd8   :  { %v251_v52 = vmax.f32 %v250_v1, 0.0  ;;  %797 = vperm.xlu1 %1833, %v723_v28   ;;  %v1270_v1 = vld [vmem:[%s2801_s6 + $0x58] sm:$0xff]  ;;  %v1288_v28 = vld [vmem:[%s2801_s6 + $0xe8] sm:$0xff] }
  0xda   :  { %v258_v56 = vmul.f32 %v256_v46, %v251_v52  ;;  %v272_v57 = vmul.f32 %v270_v50, %v251_v52  ;;  %v1266_v46 = vld [vmem:[%s2801_s6 + $0x38] sm:$0xff]  ;;  %v1265_v50 = vld [vmem:[%s2801_s6 + $0x30] sm:$0xff]  ;;  %v1267_v52 = vld [vmem:[%s2801_s6 + $0x40] sm:$0xff] }
  0xdb   :  { %812 = vperm.xlu0 %1830, %v726_v23  }
  0xdc   :  { %v259_v58 = vrot.slane %v258_v56, 4  ;;  %v273_v53 = vrot.slane %v272_v57, 4  ;;  %807 = vperm.xlu1 %1833, %v725_v32   ;;  %v1283_v32 = vld [vmem:[%s2801_s6 + $0xc0] sm:$0xff] }
  0xde   :  { %v260_v20 = vadd.f32 %v259_v58, %v258_v56  ;;  %v274_v25 = vadd.f32 %v273_v53, %v272_v57  ;;  %v1274_v56 = vld [vmem:[%s2801_s6 + $0x78] sm:$0xff]  ;;  %v1836_v57 = vld [vmem:[%s2799_s4 + $0x4] ss:$8 sps:$4 sm:$0xff]   ;;  %v1269_v53 = vld [vmem:[%s2801_s6 + $0x50] sm:$0xff] }
  0xdf   :  { %822 = vperm.xlu0 %1830, %v728_v26   ;;  %v1839_v58 = vld [vmem:[%s2799_s4 + $0x54] ss:$8 sps:$4 sm:$0xff]   ;;  %1097 = vmatprep.mubr.bf16.mxu0 %v1836_v57 }
  0xe0   :  { %v261_v55 = vrot.slane %v260_v20, 2  ;;  %v275_v54 = vrot.slane %v274_v25, 2  ;;  %817 = vperm.xlu1 %1833, %v727_v34   ;;  %1137 = vmatprep.mubr.bf16.mxu1 %v1839_v58  ;;  %v1290_v34 = vld [vmem:[%s2801_s6 + $0xf8] sm:$0xff] }
  0xe2   :  { %v262_v60 = vadd.f32 %v261_v55, %v260_v20  ;;  %v276_v2 = vadd.f32 %v275_v54, %v274_v25  ;;  %v1276_v20 = vld [vmem:[%s2801_s6 + $0x88] sm:$0xff]  ;;  %v1271_v25 = vld [vmem:[%s2801_s6 + $0x60] sm:$0xff]  ;;  %v1277_v55 = vld [vmem:[%s2801_s6 + $0x90] sm:$0xff] }
  0xe3   :  { %832 = vperm.xlu0 %1830, %v730_v29   ;;  %v1273_v54 = vld [vmem:[%s2801_s6 + $0x70] sm:$0xff] }
  0xe4   :  { %v263_v62 = vrot.slane %v262_v60, 1  ;;  %v277_v63 = vrot.slane %v276_v2, 1  ;;  %827 = vperm.xlu1 %1833, %v729_v36   ;;  %v1285_v36 = vld [vmem:[%s2801_s6 + $0xd0] sm:$0xff] }
  0xe6   :  { %v264_v3 = vadd.f32 %v263_v62, %v262_v60  ;;  %v278_v5 = vadd.f32 %v277_v63, %v276_v2  ;;  %v1275_v60 = vld [vmem:[%s2801_s6 + $0x80] sm:$0xff]  ;;  %v739_v2 = vld [vmem:[%s2800_s5 + $0xd0] sm:$0xff]  ;;  %v1280_v63 = vld [vmem:[%s2801_s6 + $0xa8] sm:$0xff] }
  0xe7   :  { %842 = vperm.xlu0 %1830, %v732_v33  }
  0xe8   :  { %v265_v6 = vadd.f32 %v264_v3, %v253_v0  ;;  %v279_v31 = vadd.f32 %v278_v5, %v267_v4  ;;  %837 = vperm.xlu1 %1833, %v731_v38   ;;  %v740_v3 = vld [vmem:[%s2800_s5 + $0xd8] sm:$0xff] }
  0xea   :  { %v293_v7 = vmul.f32 %v265_v6, %v241_v48  ;;  %v290_v8 = vsel %vm2254_vm8, 0.0, %v279_v31  ;;  %v1281_v6 = vld [vmem:[%s2801_s6 + $0xb0] sm:$0xff] }
  0xeb   :  { %v291_v9 = vmul.f32 %v290_v8, %v241_v48  ;;  %852 = vperm.xlu0 %1830, %v734_v35   ;;  %v1268_v48 = vld [vmem:[%s2801_s6 + $0x48] sm:$0xff] }
  0xec   :  { %847 = vperm.xlu1 %1833, %v733_v40  }
  0xed   :  { %v292_v10 = vadd.f32 30.0, %v291_v9 }
  0xef   :  { %v2260_v11 = vadd.f32 %v293_v7, %v292_v10  ;;  %862 = vperm.xlu0 %1830, %v736_v37   ;;  %v741_v7 = vld [vmem:[%s2800_s5 + $0xe0] sm:$0xff]  ;;  %v1282_v10 = vld [vmem:[%s2801_s6 + $0xb8] sm:$0xff] }
  0xf0   :  { %857 = vperm.xlu1 %1833, %v735_v42   ;;  %v1289_v42 = vld [vmem:[%s2801_s6 + $0xf0] sm:$0xff] }
  0xf1   :  { %2807 = vst [vmem:[#allocation6_spill] sm:$0xff] %v2260_v11 }
  0xf3   :  { %872 = vperm.xlu0 %1830, %v738_v39   ;;  %v1287_v39 = vld [vmem:[%s2801_s6 + $0xe0] sm:$0xff] }
  0xf4   :  { %867 = vperm.xlu1 %1833, %v737_v44  }
  0xf7   :  { %1298 = vperm.xlu0 %1830, %v1260_v41  }
  0xf8   :  { %1293 = vperm.xlu1 %1833, %v1259_v30  }
  0xfb   :  { %1308 = vperm.xlu0 %1830, %v1262_v43  }
  0xfc   :  { %1303 = vperm.xlu1 %1833, %v1261_v47  }
  0xff   :  { %1318 = vperm.xlu0 %1830, %v1264_v45  }
 0x100   :  { %1313 = vperm.xlu1 %1833, %v1263_v49  }
 0x103   :  { %1328 = vperm.xlu0 %1830, %v1266_v46  }
 0x104   :  { %1323 = vperm.xlu1 %1833, %v1265_v50  }
 0x107   :  { %1338 = vperm.xlu0 %1830, %v1268_v48  }
 0x108   :  { %1333 = vperm.xlu1 %1833, %v1267_v52  }
 0x10b   :  { %1348 = vperm.xlu0 %1830, %v1270_v1  }
 0x10c   :  { %1343 = vperm.xlu1 %1833, %v1269_v53  }
 0x10f   :  { %1358 = vperm.xlu0 %1830, %v1272_v51  }
 0x110   :  { %1353 = vperm.xlu1 %1833, %v1271_v25  }
 0x113   :  { %1368 = vperm.xlu0 %1830, %v1274_v56  }
 0x114   :  { %1363 = vperm.xlu1 %1833, %v1273_v54  }
 0x117   :  { %1378 = vperm.xlu0 %1830, %v1276_v20  }
 0x118   :  { %1373 = vperm.xlu1 %1833, %v1275_v60  }
 0x11b   :  { %1383 = vperm.xlu0 %1830, %v1277_v55  }
 0x11c   :  { %877 = vperm.xlu1 %1833, %v739_v2  }
 0x11f   :  { %1388 = vperm.xlu0 %1830, %v1278_v59  }
 0x120   :  { %882 = vperm.xlu1 %1833, %v740_v3  }
 0x123   :  { %1393 = vperm.xlu0 %1830, %v1279_v61  }
 0x124   :  { %887 = vperm.xlu1 %1833, %v741_v7  }
 0x127   :  { %1398 = vperm.xlu0 %1830, %v1280_v63  }
 0x128   :  { %892 = vperm.xlu1 %1833, %v742_v13  }
 0x12b   :  { %1403 = vperm.xlu0 %1830, %v1281_v6  }
 0x12c   :  { %897 = vperm.xlu1 %1833, %v743_v18  }
 0x12f   :  { %1408 = vperm.xlu0 %1830, %v1282_v10  }
 0x130   :  { %902 = vperm.xlu1 %1833, %v744_v24   ;;  %v1845_v24 = vld [vmem:[%s2799_s4 + $0x60] ss:$8 sps:$4 sm:$0xff]  }
 0x133   :  { %1418 = vperm.xlu0 %1830, %v1284_v16  }
 0x134   :  { %1413 = vperm.xlu1 %1833, %v1283_v32   ;;  %v1851_v32 = vld [vmem:[%s2799_s4 + $0x70] ss:$8 sps:$4 sm:$0xff]  }
 0x137   :  { %1428 = vperm.xlu0 %1830, %v1286_v22   ;;  %v1842_v22 = vld [vmem:[%s2799_s4 + $0x64] ss:$8 sps:$4 sm:$0xff]  }
 0x138   :  { %1423 = vperm.xlu1 %1833, %v1285_v36   ;;  %v1857_v36 = vld [vmem:[%s2799_s4 + $0x80] ss:$8 sps:$4 sm:$0xff]  }
 0x13b   :  { %1438 = vperm.xlu0 %1830, %v1288_v28   ;;  %v1848_v28 = vld [vmem:[%s2799_s4 + $0x74] ss:$8 sps:$4 sm:$0xff]  }
 0x13c   :  { %1433 = vperm.xlu1 %1833, %v1287_v39   ;;  %v1862_v39 = vld [vmem:[%s2799_s4 + $0x40] ss:$8 sps:$4 sm:$0xff]  }
 0x13f   :  { %1448 = vperm.xlu0 %1830, %v1290_v34   ;;  %v1854_v34 = vld [vmem:[%s2799_s4 + $0x84] ss:$8 sps:$4 sm:$0xff]  }
 0x140   :  { %1443 = vperm.xlu1 %1833, %v1289_v42   ;;  %v1866_v42 = vld [vmem:[%s2799_s4 + $0xa0] ss:$8 sps:$4 sm:$0xff]  }
 0x156   :  { %v2412_v62 = vpop.f32.mrf.mxu0 }
 0x158   :  { %v2417_v0 = vpop.f32.mrf.mxu0 }
 0x159   :  { %v649_v4 = vpack.c.bf16 %v2412_v62, %v2417_v0  ;;  %v1834_v0 = vld [vmem:[%s2799_s4] ss:$8 sps:$4 sm:$0xff]  }
 0x15a   :  { %v2424_v5 = vpop.f32.mrf.mxu0 }
 0x15c   :  { %v2429_v31 = vpop.f32.mrf.mxu0 }
 0x15d   :  { %v650_v8 = vpack.c.bf16 %v2424_v5, %v2429_v31 }
 0x15e   :  { %v2436_v9 = vpop.f32.mrf.mxu0 }
 0x160   :  { %v2441_v12 = vpop.f32.mrf.mxu0 }
 0x161   :  { %v651_v14 = vpack.c.bf16 %v2436_v9, %v2441_v12 }
 0x162   :  { %v2448_v15 = vpop.f32.mrf.mxu0 }
 0x164   :  { %v2453_v17 = vpop.f32.mrf.mxu0 }
 0x165   :  { %v652_v19 = vpack.c.bf16 %v2448_v15, %v2453_v17 }
 0x166   :  { %v1764_v21 = vpop.f32.mrf.mxu0 }
 0x168   :  { %v530_v23 = vpop.f32.mrf.mxu0 }
 0x169   :  { %v653_v60 = vpack.c.bf16 %v1764_v21, %v530_v23  ;;  %v1840_v21 = vld [vmem:[%s2799_s4 + $0x14] ss:$8 sps:$4 sm:$0xff]   ;;  %v1844_v23 = vld [vmem:[%s2799_s4 + $0x10] ss:$8 sps:$4 sm:$0xff]  }
 0x16a   :  { %v1767_v26 = vpop.f32.mrf.mxu0 }
 0x16c   :  { %v540_v29 = vpop.f32.mrf.mxu0 }
 0x16d   :  { %v654_v54 = vpack.c.bf16 %v1767_v26, %v540_v29  ;;  %v1846_v26 = vld [vmem:[%s2799_s4 + $0x24] ss:$8 sps:$4 sm:$0xff]   ;;  %v1850_v29 = vld [vmem:[%s2799_s4 + $0x20] ss:$8 sps:$4 sm:$0xff]  }
 0x16e   :  { %v1770_v33 = vpop.f32.mrf.mxu0 }
 0x170   :  { %v550_v35 = vpop.f32.mrf.mxu0 }
 0x171   :  { %v655_v25 = vpack.c.bf16 %v1770_v33, %v550_v35  ;;  %v1852_v33 = vld [vmem:[%s2799_s4 + $0x34] ss:$8 sps:$4 sm:$0xff]   ;;  %v1856_v35 = vld [vmem:[%s2799_s4 + $0x30] ss:$8 sps:$4 sm:$0xff]  }
 0x172   :  { %v1773_v37 = vpop.f32.mrf.mxu0 }
 0x174   :  { %v560_v38 = vpop.f32.mrf.mxu0 }
 0x175   :  { %v656_v57 = vpack.c.bf16 %v1773_v37, %v560_v38  ;;  %v1858_v37 = vld [vmem:[%s2799_s4 + $0x44] ss:$8 sps:$4 sm:$0xff]   ;;  %v1860_v38 = vld [vmem:[%s2799_s4 + $0x94] ss:$8 sps:$4 sm:$0xff]  }
 0x176   :  { %v2481_v40 = vpop.f32.mrf.mxu0 }
 0x178   :  { %v2483_v41 = vpop.f32.mrf.mxu0 }
 0x179   :  { %v657_v16 = vpack.c.bf16 %v2481_v40, %v2483_v41  ;;  %v1863_v40 = vld [vmem:[%s2799_s4 + $0x90] ss:$8 sps:$4 sm:$0xff]   ;;  %v1864_v41 = vld [vmem:[%s2799_s4 + $0xa4] ss:$8 sps:$4 sm:$0xff]  }
 0x17a   :  { %v1779_v43 = vpop.f32.mrf.mxu0 }
 0x17c   :  { %v580_v44 = vpop.f32.mrf.mxu0 }
 0x17d   :  { %v658_v7 = vpack.c.bf16 %v1779_v43, %v580_v44  ;;  %v1867_v43 = vld [vmem:[%s2799_s4 + $0xb4] ss:$8 sps:$4 sm:$0xff]   ;;  %v1869_v44 = vld [vmem:[%s2799_s4 + $0xb0] ss:$8 sps:$4 sm:$0xff]  }
 0x17e   :  { %v1782_v45 = vpop.f32.mrf.mxu0 }
 0x180   :  { %v590_v30 = vpop.f32.mrf.mxu0 }
 0x181   :  { %v659_v63 = vpack.c.bf16 %v1782_v45, %v590_v30  ;;  %v1870_v45 = vld [vmem:[%s2799_s4 + $0xc4] ss:$8 sps:$4 sm:$0xff]   ;;  %v1872_v30 = vld [vmem:[%s2799_s4 + $0xc0] ss:$8 sps:$4 sm:$0xff]  }
 0x182   :  { %v1785_v46 = vpop.f32.mrf.mxu0 }
 0x184   :  { %v600_v47 = vpop.f32.mrf.mxu0 }
 0x185   :  { %v660_v61 = vpack.c.bf16 %v1785_v46, %v600_v47  ;;  %v1873_v46 = vld [vmem:[%s2799_s4 + $0xd4] ss:$8 sps:$4 sm:$0xff]   ;;  %v1875_v47 = vld [vmem:[%s2799_s4 + $0xd0] ss:$8 sps:$4 sm:$0xff]  }
 0x186   :  { %v1788_v48 = vpop.f32.mrf.mxu0 }
 0x188   :  { %v610_v49 = vpop.f32.mrf.mxu0 }
 0x189   :  { %v661_v59 = vpack.c.bf16 %v1788_v48, %v610_v49  ;;  %v1876_v48 = vld [vmem:[%s2799_s4 + $0xe4] ss:$8 sps:$4 sm:$0xff]   ;;  %v1878_v49 = vld [vmem:[%s2799_s4 + $0xe0] ss:$8 sps:$4 sm:$0xff]  }
 0x18a   :  { %v1791_v1 = vpop.f32.mrf.mxu0 }
 0x18c   :  { %v620_v50 = vpop.f32.mrf.mxu0 }
 0x18d   :  { %v662_v55 = vpack.c.bf16 %v1791_v1, %v620_v50  ;;  %v1879_v1 = vld [vmem:[%s2799_s4 + $0xf4] ss:$8 sps:$4 sm:$0xff]   ;;  %v1881_v50 = vld [vmem:[%s2799_s4 + $0xf0] ss:$8 sps:$4 sm:$0xff]  }
 0x18e   :  { %v1794_v51 = vpop.f32.mrf.mxu0 }
 0x190   :  { %v630_v52 = vpop.f32.mrf.mxu0 }
 0x191   :  { %v663_v53 = vpack.c.bf16 %v1794_v51, %v630_v52  ;;  %v753_v51 = vpop.permute.xlu1 %752  ;;  %v748_v52 = vpop.permute.xlu0 %747 }
 0x192   :  { %v1797_v56 = vpop.f32.mrf.mxu0 }
 0x194   :  { %v640_v58 = vpop.f32.mrf.mxu0 }
 0x195   :  { %v664_v20 = vpack.c.bf16 %v1797_v56, %v640_v58  ;;  %v2592_v56 = vpop.permute.xlu1 %757 }
 0x197   :  { %1882 = vtanh.bf16 %v664_v20 }
 0x198   :  { %1884 = vtanh.bf16 %v656_v57  ;;  %v2594_v57 = vpop.permute.xlu0 %762 }
 0x199   :  { %1886 = vtanh.bf16 %v663_v53  ;;  %v2596_v58 = vpop.permute.xlu1 %767 }
 0x19a   :  { %1888 = vtanh.bf16 %v655_v25 }
 0x19b   :  { %1890 = vtanh.bf16 %v662_v55 }
 0x19c   :  { %1892 = vtanh.bf16 %v654_v54  ;;  %v2598_v53 = vpop.permute.xlu0 %772 }
 0x19d   :  { %1894 = vtanh.bf16 %v661_v59  ;;  %v2600_v20 = vpop.permute.xlu1 %777 }
 0x19e   :  { %1896 = vtanh.bf16 %v653_v60 }
 0x19f   :  { %1898 = vtanh.bf16 %v660_v61 }
 0x1a0   :  { %1900 = vtanh.bf16 %v652_v19  ;;  %v2602_v25 = vpop.permute.xlu0 %782 }
 0x1a1   :  { %1902 = vtanh.bf16 %v659_v63  ;;  %v2604_v55 = vpop.permute.xlu1 %787 }
 0x1a2   :  { %1904 = vtanh.bf16 %v651_v14 }
 0x1a3   :  { %1906 = vtanh.bf16 %v658_v7 }
 0x1a4   :  { %1908 = vtanh.bf16 %v650_v8  ;;  %v2606_v54 = vpop.permute.xlu0 %792 }
 0x1a5   :  { %v1883_v2 = vpop.eup %1882  ;;  %1910 = vtanh.bf16 %v657_v16  ;;  %v2608_v59 = vpop.permute.xlu1 %797 }
 0x1a6   :  { %v1885_v3 = vpop.eup %1884  ;;  %1636 = vmatprep.subr.bf16.mxu0 %v1883_v2  ;;  %1798 = vmatprep.subr.bf16.mxu1 %v1883_v2  ;;  %1912 = vtanh.bf16 %v649_v4  ;;  %v1837_v4 = vld [vmem:[%s2799_s4 + $0x50] ss:$8 sps:$4 sm:$0xff]   ;;  %s1602_s4 = sld [smem:[#allocation2 + $0x1]] }
 0x1a7   :  { %v1887_v6 = vpop.eup %1886  ;;  %1637 = vmatpush3.bf16.msra.mxu0 %v1885_v3  ;;  %1806 = vmatpush3.bf16.msra.mxu1 %v1885_v3 }
 0x1a8   :  { %1638 = vmatprep.subr.bf16.mxu0 %v1887_v6  ;;  %1799 = vmatprep.subr.bf16.mxu1 %v1887_v6  ;;  %v1889_v10 = vpop.eup %1888  ;;  %v2610_v60 = vpop.permute.xlu0 %802 }
 0x1a9   :  { %v1891_v13 = vpop.eup %1890  ;;  %v2612_v61 = vpop.permute.xlu1 %807 }
 0x1aa   :  { %v1893_v15 = vpop.eup %1892 }
 0x1ab   :  { %1639 = vmatpush3.bf16.msra.mxu0 %v1889_v10  ;;  %1807 = vmatpush3.bf16.msra.mxu1 %v1889_v10  ;;  %v1895_v17 = vpop.eup %1894 }
 0x1ac   :  { %1640 = vmatprep.subr.bf16.mxu0 %v1891_v13  ;;  %1800 = vmatprep.subr.bf16.mxu1 %v1891_v13  ;;  %v1897_v18 = vpop.eup %1896  ;;  %v2614_v2 = vpop.permute.xlu0 %812 }
 0x1ad   :  { %v1899_v9 = vpop.eup %1898  ;;  %v2616_v63 = vpop.permute.xlu1 %817 }
 0x1ae   :  { %v1901_v12 = vpop.eup %1900 }
 0x1af   :  { %1641 = vmatpush3.bf16.msra.mxu0 %v1893_v15  ;;  %1808 = vmatpush3.bf16.msra.mxu1 %v1893_v15  ;;  %v1903_v14 = vpop.eup %1902 }
 0x1b0   :  { %1642 = vmatprep.subr.bf16.mxu0 %v1895_v17  ;;  %1801 = vmatprep.subr.bf16.mxu1 %v1895_v17  ;;  %v1905_v5 = vpop.eup %1904  ;;  %v2618_v3 = vpop.permute.xlu0 %822 }
 0x1b1   :  { %v1907_v31 = vpop.eup %1906  ;;  %v2620_v6 = vpop.permute.xlu1 %827 }
 0x1b2   :  { %v1909_v8 = vpop.eup %1908 }
 0x1b3   :  { %1643 = vmatpush3.bf16.msra.mxu0 %v1897_v18  ;;  %1809 = vmatpush3.bf16.msra.mxu1 %v1897_v18  ;;  %v1911_v19 = vpop.eup %1910 }
 0x1b4   :  { %1644 = vmatprep.subr.bf16.mxu0 %v1899_v9  ;;  %1802 = vmatprep.subr.bf16.mxu1 %v1899_v9  ;;  %v1913_v62 = vpop.eup %1912  ;;  %v2622_v7 = vpop.permute.xlu0 %832 }
 0x1b5   :  { %v2624_v10 = vpop.permute.xlu1 %837 }
 0x1b7   :  { %1645 = vmatpush3.bf16.msra.mxu0 %v1901_v12  ;;  %1810 = vmatpush3.bf16.msra.mxu1 %v1901_v12 }
 0x1b8   :  { %1646 = vmatprep.subr.bf16.mxu0 %v1903_v14  ;;  %1803 = vmatprep.subr.bf16.mxu1 %v1903_v14  ;;  %v2626_v13 = vpop.permute.xlu0 %842 }
 0x1b9   :  { %v2628_v16 = vpop.permute.xlu1 %847 }
 0x1bb   :  { %1647 = vmatpush3.bf16.msra.mxu0 %v1905_v5  ;;  %1811 = vmatpush3.bf16.msra.mxu1 %v1905_v5 }
 0x1bc   :  { %1648 = vmatprep.subr.bf16.mxu0 %v1907_v31  ;;  %1804 = vmatprep.subr.bf16.mxu1 %v1907_v31  ;;  %v2630_v15 = vpop.permute.xlu0 %852 }
 0x1bd   :  { %v2632_v17 = vpop.permute.xlu1 %857 }
 0x1bf   :  { %1649 = vmatpush3.bf16.msra.mxu0 %v1909_v8  ;;  %1812 = vmatpush3.bf16.msra.mxu1 %v1909_v8 }
 0x1c0   :  { %1650 = vmatprep.subr.bf16.mxu0 %v1911_v19  ;;  %1805 = vmatprep.subr.bf16.mxu1 %v1911_v19  ;;  %v2634_v18 = vpop.permute.xlu0 %862 }
 0x1c1   :  { %v2636_v9 = vpop.permute.xlu1 %867 }
 0x1c2   :  { %2808 = vst [vmem:[#allocation7_spill] sm:$0xff] %v2636_v9 }
 0x1c3   :  { %1651 = vmatpush3.bf16.msra.mxu0 %v1913_v62  ;;  %1813 = vmatpush3.bf16.msra.mxu1 %v1913_v62 }
 0x1c4   :  { %v2638_v12 = vpop.permute.xlu0 %872 }
 0x1c5   :  { %2809 = vst [vmem:[#allocation8_spill] sm:$0xff] %v2638_v12  ;;  %v2640_v14 = vpop.permute.xlu1 %1293 }
 0x1c6   :  { %1098 = vmatmul.mubr.bf16.vlgmr.msra.gmra.mxu0 %v1834_v0  ;;  %1138 = vmatmul.mubr.bf16.vlgmr.msra.gmra.mxu1 %v1837_v4 }
 0x1c7   :  { %1105 = vmatprep.mubr.bf16.mxu0 %v1840_v21  ;;  %1145 = vmatprep.mubr.bf16.mxu1 %v1842_v22 }
 0x1c8   :  { %v2642_v5 = vpop.permute.xlu0 %1298 }
 0x1c9   :  { %v2644_v31 = vpop.permute.xlu1 %1303 }
 0x1cc   :  { %v2648_v62 = vpop.permute.xlu0 %1308 }
 0x1cd   :  { %v2652_v21 = vpop.permute.xlu1 %1313 }
 0x1ce   :  { %1106 = vmatmul.mubr.bf16.gmra.mxu0 %v1844_v23  ;;  %1146 = vmatmul.mubr.bf16.gmra.mxu1 %v1845_v24 }
 0x1cf   :  { %1113 = vmatprep.mubr.bf16.mxu0 %v1846_v26  ;;  %1153 = vmatprep.mubr.bf16.mxu1 %v1848_v28 }
 0x1d0   :  { %v2658_v28 = vpop.permute.xlu0 %1318 }
 0x1d6   :  { %1114 = vmatmul.mubr.bf16.gmra.mxu0 %v1850_v29  ;;  %1154 = vmatmul.mubr.bf16.gmra.mxu1 %v1851_v32 }
 0x1d7   :  { %1121 = vmatprep.mubr.bf16.mxu0 %v1852_v33  ;;  %1161 = vmatprep.mubr.bf16.mxu1 %v1854_v34  ;;  %v2662_v33 = vpop.permute.xlu1 %1323 }
 0x1de   :  { %1122 = vmatmul.mubr.bf16.gmra.mxu0 %v1856_v35  ;;  %1162 = vmatmul.mubr.bf16.gmra.mxu1 %v1857_v36 }
 0x1df   :  { %1129 = vmatprep.mubr.bf16.mxu0 %v1858_v37  ;;  %1169 = vmatprep.mubr.bf16.mxu1 %v1860_v38  ;;  %v2668_v38 = vpop.permute.xlu0 %1328 }
 0x1e6   :  { %1130 = vmatmul.mubr.bf16.gmra.mxu0 %v1862_v39  ;;  %1170 = vmatmul.mubr.bf16.gmra.mxu1 %v1863_v40 }
 0x1e7   :  { %1177 = vmatprep.mubr.bf16.mxu1 %v1864_v41  ;;  %v2672_v41 = vpop.permute.xlu1 %1333 }
 0x1eb   :  { %v2682_v12 = vpop.permute.xlu1 %1343 }
 0x1ee   :  { %1178 = vmatmul.mubr.bf16.gmra.mxu1 %v1866_v42 }
 0x1ef   :  { %1185 = vmatprep.mubr.bf16.mxu1 %v1867_v43 }
 0x1f6   :  { %1186 = vmatmul.mubr.bf16.gmra.mxu1 %v1869_v44 }
 0x1f7   :  { %1193 = vmatprep.mubr.bf16.mxu1 %v1870_v45 }
 0x1fe   :  { %1194 = vmatmul.mubr.bf16.gmra.mxu1 %v1872_v30 }
 0x1ff   :  { %1201 = vmatprep.mubr.bf16.mxu1 %v1873_v46 }
 0x206   :  { %1202 = vmatmul.mubr.bf16.gmra.mxu1 %v1875_v47 }
 0x207   :  { %1209 = vmatprep.mubr.bf16.mxu1 %v1876_v48  ;;  %v2678_v48 = vpop.permute.xlu0 %1338 }
 0x20e   :  { %1210 = vmatmul.mubr.bf16.gmra.mxu1 %v1878_v49 }
 0x20f   :  { %1217 = vmatprep.mubr.bf16.mxu1 %v1879_v1 }
 0x216   :  { %1218 = vmatmul.mubr.bf16.gmra.mxu1 %v1881_v50 }
 0x286   :  { %v1652_v8 = vpop.f32.mrf.mxu0  ;;  %v2646_v19 = vpop.f32.mrf.mxu1 }
 0x288   :  { %v1653_v0 = vpop.f32.mrf.mxu0  ;;  %v2650_v4 = vpop.f32.mrf.mxu1 }
 0x289   :  { %v1654_v43 = vadd.f32 %v1653_v0, %v1652_v8 }
 0x28a   :  { %v1655_v22 = vpop.f32.mrf.mxu0  ;;  %v2654_v23 = vpop.f32.mrf.mxu1 }
 0x28b   :  { %v1100_v50 = vadd.f32 %v1654_v43, %v748_v52  ;;  %v2690_v52 = vpop.permute.xlu0 %1348 }
 0x28c   :  { %v1656_v24 = vpop.f32.mrf.mxu0  ;;  %v2656_v26 = vpop.f32.mrf.mxu1 }
 0x28d   :  { %v1657_v42 = vadd.f32 %v1656_v24, %v1655_v22 }
 0x28e   :  { %v1658_v29 = vpop.f32.mrf.mxu0  ;;  %v2660_v32 = vpop.f32.mrf.mxu1 }
 0x28f   :  { %v1103_v49 = vadd.f32 %v1657_v42, %v753_v51 }
 0x290   :  { %v1659_v34 = vpop.f32.mrf.mxu0  ;;  %v2664_v35 = vpop.f32.mrf.mxu1 }
 0x291   :  { %v1660_v30 = vadd.f32 %v1659_v34, %v1658_v29  ;;  %1914 = vtanh.f32 %v1103_v49 }
 0x292   :  { %v1661_v36 = vpop.f32.mrf.mxu0  ;;  %v2666_v37 = vpop.f32.mrf.mxu1  ;;  %1916 = vtanh.f32 %v1100_v50 }
 0x293   :  { %v1108_v22 = vadd.f32 %v1660_v30, %v2592_v56  ;;  %v2695_v56 = vpop.permute.xlu1 %1353 }
 0x294   :  { %v1662_v39 = vpop.f32.mrf.mxu0  ;;  %v2670_v40 = vpop.f32.mrf.mxu1 }
 0x295   :  { %v1663_v1 = vadd.f32 %v1662_v39, %v1661_v36  ;;  %1918 = vtanh.f32 %v1108_v22 }
 0x296   :  { %v1664_v44 = vpop.f32.mrf.mxu0  ;;  %v2674_v45 = vpop.f32.mrf.mxu1 }
 0x297   :  { %v1111_v29 = vadd.f32 %v1663_v1, %v2594_v57  ;;  %v2703_v1 = vpop.permute.xlu0 %1358 }
 0x298   :  { %v1665_v46 = vpop.f32.mrf.mxu0  ;;  %v2676_v47 = vpop.f32.mrf.mxu1 }
 0x299   :  { %v1666_v8 = vadd.f32 %v1665_v46, %v1664_v44  ;;  %1920 = vtanh.f32 %v1111_v29 }
 0x29a   :  { %v1667_v27 = vpop.f32.mrf.mxu0  ;;  %v2680_v11 = vpop.f32.mrf.mxu1 }
 0x29b   :  { %v1116_v36 = vadd.f32 %v1666_v8, %v2596_v58  ;;  %v2707_v8 = vpop.permute.xlu1 %1363 }
 0x29c   :  { %v1668_v0 = vpop.f32.mrf.mxu0  ;;  %v2685_v24 = vpop.f32.mrf.mxu1 }
 0x29d   :  { %v1669_v34 = vadd.f32 %v1668_v0, %v1667_v27  ;;  %1922 = vtanh.f32 %v1116_v36  ;;  %v1687_v36 = vadd.f32 %v2656_v26, %v2654_v23 }
 0x29e   :  { %v1670_v9 = vpop.f32.mrf.mxu0  ;;  %v2688_v51 = vpop.f32.mrf.mxu1 }
 0x29f   :  { %v1119_v43 = vadd.f32 %v1669_v34, %v2598_v53  ;;  %v1915_v34 = vpop.eup %1914 }
 0x2a0   :  { %v1671_v39 = vpop.f32.mrf.mxu0  ;;  %v2693_v42 = vpop.f32.mrf.mxu1 }
 0x2a1   :  { %v1672_v44 = vadd.f32 %v1671_v39, %v1670_v9  ;;  %1924 = vtanh.f32 %v1119_v43  ;;  %v1684_v9 = vadd.f32 %v2650_v4, %v2646_v19  ;;  %v1690_v4 = vadd.f32 %v2664_v35, %v2660_v32 }
 0x2a2   :  { %v1673_v57 = vpop.f32.mrf.mxu0  ;;  %v2698_v27 = vpop.f32.mrf.mxu1 }
 0x2a3   :  { %v1124_v30 = vadd.f32 %v1672_v44, %v2600_v20  ;;  %v1917_v44 = vpop.eup %1916  ;;  %v1140_v19 = vadd.f32 %v1684_v9, %v2608_v59 }
 0x2a4   :  { %v1674_v46 = vpop.f32.mrf.mxu0  ;;  %v2701_v49 = vpop.f32.mrf.mxu1  ;;  %v1451_v59 = vmul.f32 %v1917_v44, %v2640_v14 }
 0x2a5   :  { %v1675_v58 = vadd.f32 %v1674_v46, %v1673_v57  ;;  %1926 = vtanh.f32 %v1124_v30  ;;  %v2718_v57 = vpop.permute.xlu0 %1368  ;;  %v1919_v30 = vpop.eup %1918 }
 0x2a6   :  { %v1676_v50 = vpop.f32.mrf.mxu0  ;;  %v2705_v22 = vpop.f32.mrf.mxu1  ;;  %v1453_v9 = vmul.f32 %v1919_v30, %v2644_v31 }
 0x2a7   :  { %v1127_v53 = vadd.f32 %v1675_v58, %v2602_v25  ;;  %v1921_v26 = vpop.eup %1920 }
 0x2a8   :  { %v1677_v0 = vpop.f32.mrf.mxu0  ;;  %v2712_v20 = vpop.f32.mrf.mxu1 }
 0x2a9   :  { %1928 = vtanh.f32 %v1127_v53  ;;  %v1678_v29 = vadd.f32 %v1677_v0, %v1676_v50  ;;  %v1452_v50 = vmul.f32 %v1915_v34, %v2642_v5  ;;  %v2725_v53 = vpop.permute.xlu1 %1373  ;;  %v1143_v0 = vadd.f32 %v1687_v36, %v2610_v60 }
 0x2aa   :  { %v1679_v39 = vpop.f32.mrf.mxu0  ;;  %v2716_v43 = vpop.f32.mrf.mxu1  ;;  %v1148_v5 = vadd.f32 %v1690_v4, %v2612_v61  ;;  %v1696_v34 = vadd.f32 %v2676_v47, %v2674_v45  ;;  %v1454_v60 = vmul.f32 %v1921_v26, %v2648_v62  ;;  %v1699_v61 = vadd.f32 %v2685_v24, %v2680_v11 }
 0x2ab   :  { %v1132_v25 = vadd.f32 %v1678_v29, %v2604_v55  ;;  %v1693_v55 = vadd.f32 %v2670_v40, %v2666_v37  ;;  %v1923_v35 = vpop.eup %1922  ;;  %v2737_v40 = vpop.permute.xlu0 %1378  ;;  %v1702_v47 = vadd.f32 %v2693_v42, %v2688_v51  ;;  %v1708_v26 = vadd.f32 %v2712_v20, %v2705_v22 }
 0x2ac   :  { %v1680_v46 = vpop.f32.mrf.mxu0  ;;  %v1710_v58 = vpop.f32.mrf.mxu1  ;;  %v1455_v36 = vmul.f32 %v1923_v35, %v2652_v21  ;;  %v1156_v62 = vadd.f32 %v1696_v34, %v2616_v63  ;;  %v1705_v21 = vadd.f32 %v2701_v49, %v2698_v27  ;;  %v1159_v24 = vadd.f32 %v1699_v61, %v2618_v3 }
 0x2ad   :  { %1930 = vtanh.f32 %v1132_v25  ;;  %v1681_v23 = vadd.f32 %v1680_v46, %v1679_v39  ;;  %v1483_v25 = vadd.f32 %v1452_v50, %v1451_v59  ;;  %v1151_v14 = vadd.f32 %v1693_v55, %v2614_v2  ;;  %v2743_v45 = vpop.permute.xlu1 %877 }
 0x2ae   :  { %v1712_v29 = vpop.f32.mrf.mxu1  ;;  %1932 = vtanh.f32 %v1140_v19  ;;  %v1925_v37 = vpop.eup %1924  ;;  %v1164_v63 = vadd.f32 %v1702_v47, %v2620_v6  ;;  %v1167_v49 = vadd.f32 %v1705_v21, %v2622_v7  ;;  %v1711_v59 = vadd.f32 %v1710_v58, %v2716_v43 }
 0x2af   :  { %v1135_v32 = vadd.f32 %v1681_v23, %v2606_v54  ;;  %v1484_v54 = vadd.f32 %v1483_v25, %v1453_v9  ;;  %v1456_v2 = vmul.f32 %v1925_v37, %v2658_v28  ;;  %v2753_v23 = vpop.permute.xlu0 %1383 }
 0x2b0   :  { %v1713_v39 = vpop.f32.mrf.mxu1 }
 0x2b1   :  { %1934 = vtanh.f32 %v1135_v32  ;;  %v1485_v19 = vadd.f32 %v1484_v54, %v1454_v60  ;;  %v2759_v27 = vpop.permute.xlu1 %882  ;;  %v1714_v35 = vadd.f32 %v1713_v39, %v1712_v29 }
 0x2b2   :  { %1936 = vtanh.f32 %v1143_v0  ;;  %v1715_v31 = vpop.f32.mrf.mxu1  ;;  %v1927_v44 = vpop.eup %1926 }
 0x2b3   :  { %1938 = vtanh.f32 %v1148_v5  ;;  %v1486_v11 = vadd.f32 %v1485_v19, %v1455_v36  ;;  %v1457_v50 = vmul.f32 %v1927_v44, %v2662_v33  ;;  %v2765_v20 = vpop.permute.xlu0 %1388  ;;  %v1180_v29 = vadd.f32 %v1714_v35, %v2628_v16 }
 0x2b4   :  { %v1716_v30 = vpop.f32.mrf.mxu1  ;;  %1940 = vtanh.f32 %v1151_v14 }
 0x2b5   :  { %1942 = vtanh.f32 %v1156_v62  ;;  %v1487_v42 = vadd.f32 %v1486_v11, %v1456_v2  ;;  %v1717_v60 = vadd.f32 %v1716_v30, %v1715_v31  ;;  %v2769_v43 = vpop.permute.xlu1 %887 }
 0x2b6   :  { %v1929_v4 = vpop.eup %1928  ;;  %v1718_v46 = vpop.f32.mrf.mxu1  ;;  %1944 = vtanh.f32 %v1159_v24 }
 0x2b7   :  { %v1458_v28 = vmul.f32 %v1929_v4, %v2668_v38  ;;  %v1488_v33 = vadd.f32 %v1487_v42, %v1457_v50  ;;  %1946 = vtanh.f32 %v1164_v63  ;;  %v1172_v38 = vadd.f32 %v1708_v26, %v2624_v10  ;;  %v1394_v31 = vpop.permute.xlu0 %1393 }
 0x2b8   :  { %v1719_v51 = vpop.f32.mrf.mxu1  ;;  %1948 = vtanh.f32 %v1167_v49 }
 0x2b9   :  { %v1489_v32 = vadd.f32 %v1488_v33, %v1458_v28  ;;  %1950 = vtanh.f32 %v1172_v38  ;;  %v1720_v39 = vadd.f32 %v1719_v51, %v1718_v46  ;;  %v893_v2 = vpop.permute.xlu1 %892  ;;  %v2810_v51 = vld [vmem:[#allocation7_spill] sm:$0xff] }
 0x2ba   :  { %v1931_v0 = vpop.eup %1930  ;;  %v1721_v3 = vpop.f32.mrf.mxu1 }
 0x2bb   :  { %v1459_v55 = vmul.f32 %v1931_v0, %v2672_v41  ;;  %v1933_v9 = vpop.eup %1932  ;;  %v1175_v41 = vadd.f32 %v1711_v59, %v2626_v13  ;;  %v1183_v13 = vadd.f32 %v1717_v60, %v2630_v15  ;;  %v1188_v19 = vadd.f32 %v1720_v39, %v2632_v17  ;;  %v1399_v28 = vpop.permute.xlu0 %1398 }
 0x2bc   :  { %v1722_v6 = vpop.f32.mrf.mxu1  ;;  %v1461_v58 = vmul.f32 %v1933_v9, %v2682_v12 }
 0x2bd   :  { %v1490_v34 = vadd.f32 %v1489_v32, %v1459_v55  ;;  %1952 = vtanh.f32 %v1175_v41  ;;  %v898_v33 = vpop.permute.xlu1 %897 }
 0x2be   :  { %v1935_v22 = vpop.eup %1934  ;;  %v1724_v5 = vpop.f32.mrf.mxu1  ;;  %1954 = vtanh.f32 %v1180_v29 }
 0x2bf   :  { %v1937_v7 = vpop.eup %1936  ;;  %v1460_v25 = vmul.f32 %v1935_v22, %v2678_v48  ;;  %v1723_v48 = vadd.f32 %v1722_v6, %v1721_v3  ;;  %1956 = vtanh.f32 %v1183_v13  ;;  %v2811_v3 = vld [vmem:[#allocation8_spill] sm:$0xff] }
 0x2c0   :  { %v1725_v37 = vpop.f32.mrf.mxu1  ;;  %v1939_v14 = vpop.eup %1938  ;;  %v1462_v54 = vmul.f32 %v1937_v7, %v2690_v52  ;;  %1958 = vtanh.f32 %v1188_v19 }
 0x2c1   :  { %v1491_v10 = vadd.f32 %v1490_v34, %v1460_v25  ;;  %v1941_v61 = vpop.eup %1940  ;;  %v1463_v62 = vmul.f32 %v1939_v14, %v2695_v56  ;;  %v1726_v16 = vadd.f32 %v1725_v37, %v1724_v5  ;;  %v1191_v46 = vadd.f32 %v1723_v48, %v2634_v18  ;;  %v1404_v7 = vpop.permute.xlu0 %1403 }
 0x2c2   :  { %v1727_v36 = vpop.f32.mrf.mxu1  ;;  %v1943_v47 = vpop.eup %1942  ;;  %v1464_v52 = vmul.f32 %v1941_v61, %v2703_v1 }
 0x2c3   :  { %v1492_v44 = vadd.f32 %v1491_v10, %v1461_v58  ;;  %v1945_v11 = vpop.eup %1944  ;;  %v1465_v24 = vmul.f32 %v1943_v47, %v2707_v8  ;;  %v1196_v42 = vadd.f32 %v1726_v16, %v2810_v51  ;;  %1960 = vtanh.f32 %v1191_v46  ;;  %v903_v58 = vpop.permute.xlu1 %902 }
 0x2c4   :  { %v1728_v12 = vpop.f32.mrf.mxu1  ;;  %v1947_v50 = vpop.eup %1946  ;;  %v1466_v1 = vmul.f32 %v1945_v11, %v2718_v57 }
 0x2c5   :  { %v1493_v30 = vadd.f32 %v1492_v44, %v1462_v54  ;;  %v1729_v15 = vadd.f32 %v1728_v12, %v1727_v36  ;;  %v1949_v0 = vpop.eup %1948  ;;  %v1467_v55 = vmul.f32 %v1947_v50, %v2725_v53  ;;  %1962 = vtanh.f32 %v1196_v42  ;;  %v1409_v61 = vpop.permute.xlu0 %1408 }
 0x2c6   :  { %v1730_v4 = vpop.f32.mrf.mxu1  ;;  %v1951_v32 = vpop.eup %1950  ;;  %v1468_v35 = vmul.f32 %v1949_v0, %v2737_v40 }
 0x2c7   :  { %v1494_v21 = vadd.f32 %v1493_v30, %v1463_v62  ;;  %v1199_v18 = vadd.f32 %v1729_v15, %v2811_v3  ;;  %v1469_v25 = vmul.f32 %v1951_v32, %v2753_v23  ;;  %v1414_v12 = vpop.permute.xlu1 %1413 }
 0x2c8   :  { %v1731_v56 = vpop.f32.mrf.mxu1 }
 0x2c9   :  { %v1495_v63 = vadd.f32 %v1494_v21, %v1464_v52  ;;  %v1732_v17 = vadd.f32 %v1731_v56, %v1730_v4  ;;  %1964 = vtanh.f32 %v1199_v18  ;;  %v1419_v46 = vpop.permute.xlu0 %1418 }
 0x2ca   :  { %v1733_v26 = vpop.f32.mrf.mxu1  ;;  %v1953_v5 = vpop.eup %1952 }
 0x2cb   :  { %v1496_v49 = vadd.f32 %v1495_v63, %v1465_v24  ;;  %v1204_v6 = vadd.f32 %v1732_v17, %v2743_v45  ;;  %v1955_v60 = vpop.eup %1954  ;;  %v1470_v37 = vmul.f32 %v1953_v5, %v2765_v20  ;;  %v1424_v50 = vpop.permute.xlu1 %1423 }
 0x2cc   :  { %v1734_v8 = vpop.f32.mrf.mxu1  ;;  %v1957_v10 = vpop.eup %1956  ;;  %v1471_v39 = vmul.f32 %v1955_v60, %v1394_v31 }
 0x2cd   :  { %v1497_v59 = vadd.f32 %v1496_v49, %v1466_v1  ;;  %v1735_v9 = vadd.f32 %v1734_v8, %v1733_v26  ;;  %1966 = vtanh.f32 %v1204_v6  ;;  %v1959_v36 = vpop.eup %1958  ;;  %v1472_v13 = vmul.f32 %v1957_v10, %v1399_v28  ;;  %v1429_v0 = vpop.permute.xlu0 %1428 }
 0x2ce   :  { %v1736_v38 = vpop.f32.mrf.mxu1  ;;  %v1473_v30 = vmul.f32 %v1959_v36, %v1404_v7  ;;  %v1524_v10 = vstv %s1522_s8  ;;  %v2813_v36 = vld [vmem:[#allocation5_spill] sm:$0xff] }
 0x2cf   :  { %v1498_v22 = vadd.f32 %v1497_v59, %v1467_v55  ;;  %v1207_v57 = vadd.f32 %v1735_v9, %v2759_v27  ;;  %v1434_v18 = vpop.permute.xlu1 %1433 }
 0x2d0   :  { %v1737_v34 = vpop.f32.mrf.mxu1  ;;  %v1961_v62 = vpop.eup %1960 }
 0x2d1   :  { %v1499_v53 = vadd.f32 %v1498_v22, %v1468_v35  ;;  %v1738_v41 = vadd.f32 %v1737_v34, %v1736_v38  ;;  %1968 = vtanh.f32 %v1207_v57  ;;  %v1474_v4 = vmul.f32 %v1961_v62, %v1409_v61  ;;  %v1439_v59 = vpop.permute.xlu0 %1438 }
 0x2d2   :  { %v1739_v45 = vpop.f32.mrf.mxu1 }
 0x2d3   :  { %v1500_v14 = vadd.f32 %v1499_v53, %v1469_v25  ;;  %v1212_v40 = vadd.f32 %v1738_v41, %v2769_v43  ;;  %v1963_v43 = vpop.eup %1962  ;;  %v1444_v38 = vpop.permute.xlu1 %1443 }
 0x2d4   :  { %v1740_v29 = vpop.f32.mrf.mxu1  ;;  %v1475_v24 = vmul.f32 %v1963_v43, %v1414_v12 }
 0x2d5   :  { %v1501_v27 = vadd.f32 %v1500_v14, %v1470_v37  ;;  %v1741_v54 = vadd.f32 %v1740_v29, %v1739_v45  ;;  %1970 = vtanh.f32 %v1212_v40  ;;  %v1449_v5 = vpop.permute.xlu0 %1448  ;;  %v1520_v37 = vstv %s1602_s4  ;;  %v2812_v29 = vld [vmem:[#allocation6_spill] sm:$0xff] }
 0x2d6   :  { %v1742_v23 = vpop.f32.mrf.mxu1  ;;  %v1965_v21 = vpop.eup %1964 }
 0x2d7   :  { %v1502_v44 = vadd.f32 %v1501_v27, %v1471_v39  ;;  %v1215_v48 = vadd.f32 %v1741_v54, %v893_v2  ;;  %v1476_v51 = vmul.f32 %v1965_v21, %v1419_v46 }
 0x2d8   :  { %v1743_v47 = vpop.f32.mrf.mxu1 }
 0x2d9   :  { %v1503_v20 = vadd.f32 %v1502_v44, %v1472_v13  ;;  %1972 = vtanh.f32 %v1215_v48  ;;  %v1744_v19 = vadd.f32 %v1743_v47, %v1742_v23 }
 0x2da   :  { %v1745_v16 = vpop.f32.mrf.mxu1  ;;  %v1967_v2 = vpop.eup %1966 }
 0x2db   :  { %v1504_v52 = vadd.f32 %v1503_v20, %v1473_v30  ;;  %v1220_v31 = vadd.f32 %v1744_v19, %v898_v33  ;;  %v1477_v26 = vmul.f32 %v1967_v2, %v1424_v50 }
 0x2dc   :  { %v1746_v15 = vpop.f32.mrf.mxu1 }
 0x2dd   :  { %v1505_v11 = vadd.f32 %v1504_v52, %v1474_v4  ;;  %1974 = vtanh.f32 %v1220_v31  ;;  %v1747_v56 = vadd.f32 %v1746_v15, %v1745_v16 }
 0x2de   :  { %v1969_v17 = vpop.eup %1968 }
 0x2df   :  { %v1506_v63 = vadd.f32 %v1505_v11, %v1475_v24  ;;  %v1223_v42 = vadd.f32 %v1747_v56, %v903_v58  ;;  %v1478_v49 = vmul.f32 %v1969_v17, %v1429_v0 }
 0x2e1   :  { %v1507_v28 = vadd.f32 %v1506_v63, %v1476_v51  ;;  %1976 = vtanh.f32 %v1223_v42 }
 0x2e2   :  { %v1971_v3 = vpop.eup %1970 }
 0x2e3   :  { %v1508_v1 = vadd.f32 %v1507_v28, %v1477_v26  ;;  %v1479_v8 = vmul.f32 %v1971_v3, %v1434_v18 }
 0x2e5   :  { %v1509_v33 = vadd.f32 %v1508_v1, %v1478_v49 }
 0x2e6   :  { %v1973_v55 = vpop.eup %1972 }
 0x2e7   :  { %v1510_v6 = vadd.f32 %v1509_v33, %v1479_v8  ;;  %v1480_v9 = vmul.f32 %v1973_v55, %v1439_v59 }
 0x2e9   :  { %v1511_v22 = vadd.f32 %v1510_v6, %v1480_v9 }
 0x2ea   :  { %v1975_v32 = vpop.eup %1974 }
 0x2eb   :  { %v1481_v35 = vmul.f32 %v1975_v32, %v1444_v38 }
 0x2ed   :  { %v1512_v7 = vadd.f32 %v1511_v22, %v1481_v35 }
 0x2ee   :  { %v1977_v57 = vpop.eup %1976 }
 0x2ef   :  { %v1482_v34 = vmul.f32 %v1977_v57, %v1449_v5 }
 0x2f1   :  { %v1513_v25 = vadd.f32 %v1512_v7, %v1482_v34 }
 0x2f3   :  { %v1514_v53 = vrot.slane %v1513_v25, 4 }
 0x2f5   :  { %v1515_v41 = vadd.f32 %v1514_v53, %v1513_v25 }
 0x2f7   :  { %v1516_v60 = vrot.slane %v1515_v41, 2 }
 0x2f9   :  { %v1517_v58 = vadd.f32 %v1516_v60, %v1515_v41 }
 0x2fb   :  { %v1518_v45 = vrot.slane %v1517_v58, 1 }
 0x2fd   :  { %v1519_v14 = vadd.f32 %v1518_v45, %v1517_v58 }
 0x2ff   :  { %v1521_v40 = vadd.f32 %v1520_v37, %v1519_v14 }
 0x301   :  { %v1523_v27 = vadd.f32 %v1521_v40, %v2812_v29 }
 0x303   :  { %v1525_v39 = vmul.f32 %v1524_v10, %v1523_v27 }
 0x305   :  { %v1527_v54 = vrot.slane %v1525_v39, 5 }
 0x307   :  { %v1529_v61 = vadd.f32 %v1527_v54, %v2813_v36 }
 0x309   :  { %v1530_v23 = vmax.f32 %v1529_v61, 12.0 }
 0x30b   :  { %v1531_v44 = vmin.f32 %v1530_v23, 100.0 }
 0x30d   :  { %1532 = vst [vmem:[%s2802_s7 - $0x7] sm:$0x80] %v1531_v44 }
 0x30e   :  { %1537 = vsyncpa [#allocation3], 1 }

</bundles_post_ra>
